<compile_context>
chip_gen: v7x
topology: tpu7x:2x2x1
jax: 0.10.0
libtpu: 0.0.40
codegen_flags: <defaults>
</compile_context>

<pallas_src>
import math
from functools import partial

import jax
import jax.numpy as jnp
from jax.experimental import pallas as pl
from jax.experimental.pallas import tpu as pltpu


# ---------------------------------------------------------------------------
# Helpers
# ---------------------------------------------------------------------------
def _round_up(x: int, m: int) -> int:
    return ((x + m - 1) // m) * m


def _nbytes(shape, dtype) -> int:
    n = 1
    for s in shape:
        n *= int(s)
    return n * jnp.dtype(dtype).itemsize


def _pick_tile(n: int, max_single: int = 512) -> int:
    """Row-tile choice: one tile for small n, else the largest candidate whose
    round-up padding stays <= ~12.5% of n (bounds padded-row waste)."""
    n8 = _round_up(max(int(n), 1), 8)
    if n8 <= max_single:
        return n8
    for t in (512, 384, 256, 128):
        if (_round_up(n, t) - n) * 8 <= n:
            return t
    return 128


def _vmem_limit(block_bytes: int) -> int:
    """Double-buffered pipeline footprint + headroom, capped for v7x (64 MiB
    physical per TensorCore); comfortably below v5e/v6e's 128 MiB."""
    need = 2 * int(block_bytes) + (8 << 20)
    return int(min(48 << 20, max(32 << 20, need)))


# ---------------------------------------------------------------------------
# Linear:  y = x @ W + b      (W stored as (in_features, out_features))
# ---------------------------------------------------------------------------
def _linear_kernel(x_ref, w_ref, b_ref, o_ref):
    # bf16 operands feed the MXU at full rate on v5e/v6e/v7x; accumulate f32.
    x = x_ref[...].astype(jnp.bfloat16)
    w = w_ref[...].astype(jnp.bfloat16)
    acc = jnp.dot(x, w, preferred_element_type=jnp.float32)
    o_ref[...] = (acc + b_ref[...].astype(jnp.float32)).astype(o_ref.dtype)


def linear_pallas(x2d, w, b, *, out_dtype=None, tm=None):
    """x2d: (M, Kin) -> (M, Kout) with weights/bias kept resident in VMEM."""
    M, Kin = x2d.shape
    Kout = w.shape[1]
    out_dtype = x2d.dtype if out_dtype is None else out_dtype

    tm = _pick_tile(M) if tm is None else min(int(tm), _round_up(M, 8))
    Mp = _round_up(M, tm)
    if Mp != M:
        x2d = jnp.pad(x2d, ((0, Mp - M), (0, 0)))

    block_bytes = (_nbytes((tm, Kin), x2d.dtype)
                   + _nbytes((Kin, Kout), w.dtype)
                   + _nbytes((1, Kout), b.dtype)
                   + _nbytes((tm, Kout), out_dtype)
                   + _nbytes((tm, Kout), jnp.float32))  # f32 accumulator temp

    out = pl.pallas_call(
        _linear_kernel,
        out_shape=jax.ShapeDtypeStruct((Mp, Kout), out_dtype),
        grid_spec=pltpu.PrefetchScalarGridSpec(
            num_scalar_prefetch=0,
            grid=(Mp // tm,),
            in_specs=[
                pl.BlockSpec((tm, Kin), lambda i: (i, 0)),    # x row tile
                pl.BlockSpec((Kin, Kout), lambda i: (0, 0)),  # resident weight
                pl.BlockSpec((1, Kout), lambda i: (0, 0)),    # resident bias
            ],
            out_specs=pl.BlockSpec((tm, Kout), lambda i: (i, 0)),
        ),
        compiler_params=pltpu.CompilerParams(
            dimension_semantics=("parallel",),
            vmem_limit_bytes=_vmem_limit(block_bytes),
        ),
        cost_estimate=pl.CostEstimate(
            flops=2 * Mp * Kin * Kout,
            transcendentals=0,
            bytes_accessed=(_nbytes((Mp, Kin), x2d.dtype)
                            + _nbytes((Kin, Kout), w.dtype)
                            + _nbytes((Kout,), b.dtype)
                            + _nbytes((Mp, Kout), out_dtype)),
        ),
    )(x2d, w, b.reshape(1, Kout))

    return out[:M] if Mp != M else out


# ---------------------------------------------------------------------------
# Multi-head scaled-dot-product attention core, head axis folded into the
# BlockSpecs.  Inputs stay channel-interleaved: (B, N, H*Dh).
#   outputs: attended values (B, Nq, H*Dh)  (already in "recombined" order)
#            scores          (B, H, Nq, Nkp) == torch's attn_ (pre-slice)
# ---------------------------------------------------------------------------
def _mha_kernel(q_ref, k_ref, v_ref, o_ref, s_ref, *, scale, nk_valid):
    q = q_ref[0]   # (tq,  Dh)  bf16
    k = k_ref[0]   # (Nkp, Dh)  bf16
    v = v_ref[0]   # (Nkp, Dh)  bf16

    # scores = q @ k^T * scale  (contract the head dim of both operands)
    s = jax.lax.dot_general(
        q, k, (((1,), (1,)), ((), ())),
        preferred_element_type=jnp.float32) * scale              # (tq, Nkp) f32
    s_ref[0, 0] = s.astype(s_ref.dtype)                          # attn_ output

    # mask padded key columns (static branch: only emitted when Nk was padded)
    if nk_valid is not None:
        col = jax.lax.broadcasted_iota(jnp.int32, s.shape, 1)
        s = jnp.where(col < nk_valid, s, -1e30)

    # numerically stable softmax along keys (exp on EUP; recip on EUP slot)
    m = jnp.max(s, axis=-1, keepdims=True)
    p = jnp.exp(s - m)
    denom = jnp.sum(p, axis=-1, keepdims=True)
    p = p * pl.reciprocal(denom, approx=True)

    o = jnp.dot(p.astype(v.dtype), v, preferred_element_type=jnp.float32)
    o_ref[0] = o.astype(o_ref.dtype)


def mha_pallas(q_p, k_p, v_p, *, num_heads, scores_dtype=jnp.float32, tq=None):
    """q_p: (B, Nq, Di), k_p/v_p: (B, Nk, Di) with Di = num_heads * Dh.
    Returns (out (B, Nq, Di) in recombined channel order, attn_ (B, H, Nq, Nk))."""
    B, Nq, Di = q_p.shape
    _, Nk, _ = k_p.shape
    H = num_heads
    assert Di % H == 0
    Dh = Di // H
    # Head-folded BlockSpecs require a lane-aligned per-head channel slice.
    assert H == 1 or Dh % 128 == 0, (
        "mha_pallas (fused-head layout) needs head_dim % 128 == 0; "
        "use a transpose-based layout for other head dims.")
    scale = 1.0 / math.sqrt(Dh)

    tq = _pick_tile(Nq) if tq is None else min(int(tq), _round_up(Nq, 8))
    Nqp = _round_up(Nq, tq)
    Nkp = _round_up(Nk, 128)          # lane-dense score stores / MXU N columns
    if Nqp != Nq:
        q_p = jnp.pad(q_p, ((0, 0), (0, Nqp - Nq), (0, 0)))
    if Nkp != Nk:
        k_p = jnp.pad(k_p, ((0, 0), (0, Nkp - Nk), (0, 0)))   # padded keys
        v_p = jnp.pad(v_p, ((0, 0), (0, Nkp - Nk), (0, 0)))   # zero values
    nk_valid = Nk if Nkp != Nk else None

    block_bytes = (_nbytes((1, tq, Dh), q_p.dtype)
                   + 2 * _nbytes((1, Nkp, Dh), k_p.dtype)
                   + _nbytes((1, tq, Dh), q_p.dtype)            # out block
                   + _nbytes((1, 1, tq, Nkp), scores_dtype)
                   + 4 * tq * Nkp * 4)                          # f32 s/p temporaries

    out, scores = pl.pallas_call(
        partial(_mha_kernel, scale=scale, nk_valid=nk_valid),
        out_shape=(
            jax.ShapeDtypeStruct((B, Nqp, Di), q_p.dtype),      # heads interleaved
            jax.ShapeDtypeStruct((B, H, Nqp, Nkp), scores_dtype),
        ),
        grid_spec=pltpu.PrefetchScalarGridSpec(
            num_scalar_prefetch=0,
            # (b, h) outer so the resident K/V block only changes on head/batch
            # switches; q-tile axis innermost.
            grid=(B, H, Nqp // tq),
            in_specs=[
                pl.BlockSpec((1, tq, Dh), lambda b, h, i: (b, i, h)),   # q tile, head slice
                pl.BlockSpec((1, Nkp, Dh), lambda b, h, i: (b, 0, h)),  # full K, head slice
                pl.BlockSpec((1, Nkp, Dh), lambda b, h, i: (b, 0, h)),  # full V, head slice
            ],
            out_specs=(
                pl.BlockSpec((1, tq, Dh), lambda b, h, i: (b, i, h)),       # attended values
                pl.BlockSpec((1, 1, tq, Nkp), lambda b, h, i: (b, h, i, 0)),  # attn_
            ),
        ),
        compiler_params=pltpu.CompilerParams(
            dimension_semantics=("parallel", "parallel", "parallel"),
            vmem_limit_bytes=_vmem_limit(block_bytes),
        ),
        cost_estimate=pl.CostEstimate(
            flops=4 * B * H * Nqp * Nkp * Dh,
            transcendentals=B * H * Nqp * Nkp,
            bytes_accessed=(2 * _nbytes((B, Nqp, Di), q_p.dtype)
                            + 2 * _nbytes((B, Nkp, Di), k_p.dtype)
                            + _nbytes((B, H, Nqp, Nkp), scores_dtype)),
        ),
    )(q_p, k_p, v_p)

    if Nqp != Nq:
        out = out[:, :Nq]
        scores = scores[:, :, :Nq]
    if Nkp != Nk:
        scores = scores[..., :Nk]
    return out, scores


# ---------------------------------------------------------------------------
# Full module forward
# ---------------------------------------------------------------------------
@partial(jax.jit, static_argnames=("num_heads",))
def attention_forward(q, k, v, params, *, num_heads):
    """q: (B, Nq, E), k/v: (B, Nk, E). Returns (out (B,Nq,E), attn_ (B,H,Nq,Nk))."""
    wq, bq, wk, bk, wv, bv, wo, bo = params
    B, Nq, E = q.shape
    _, Nk, _ = k.shape
    Di = wq.shape[1]            # internal_dim

    # Projections (flattened over tokens), emitted in bf16 so the attention
    # kernel reads half the HBM bytes and feeds the MXU natively.
    q_p = linear_pallas(q.reshape(B * Nq, E), wq, bq,
                        out_dtype=jnp.bfloat16).reshape(B, Nq, Di)
    k_p = linear_pallas(k.reshape(B * Nk, E), wk, bk,
                        out_dtype=jnp.bfloat16).reshape(B, Nk, Di)
    v_p = linear_pallas(v.reshape(B * Nk, E), wv, bv,
                        out_dtype=jnp.bfloat16).reshape(B, Nk, Di)

    # Head split + attention + head recombine fused into one pallas_call
    # (no XLA transposes).
    outh, attn_ = mha_pallas(q_p, k_p, v_p, num_heads=num_heads)

    # Output projection back to the module's dtype.
    out = linear_pallas(outh.reshape(B * Nq, Di), wo, bo,
                        out_dtype=q.dtype).reshape(B, Nq, E)
    return out, attn_


# ---------------------------------------------------------------------------
# Params / reference / demo
# ---------------------------------------------------------------------------
def init_params(key, embedding_dim, num_heads, downsample_rate=1,
                dtype=jnp.float32):
    """Deterministic nn.Linear-style init; weights stored as (in, out)."""
    internal_dim = embedding_dim // downsample_rate
    assert internal_dim % num_heads == 0
    ks = jax.random.split(key, 8)

    def lin(kw, kb, fan_in, fan_out):
        lim = 1.0 / math.sqrt(fan_in)
        w = jax.random.uniform(kw, (fan_in, fan_out), dtype, -lim, lim)
        b = jax.random.uniform(kb, (fan_out,), dtype, -lim, lim)
        return w, b

    wq, bq = lin(ks[0], ks[1], embedding_dim, internal_dim)
    wk, bk = lin(ks[2], ks[3], embedding_dim, internal_dim)
    wv, bv = lin(ks[4], ks[5], embedding_dim, internal_dim)
    wo, bo = lin(ks[6], ks[7], internal_dim, embedding_dim)
    return (wq, bq, wk, bk, wv, bv, wo, bo)


def _reference(q, k, v, params, num_heads):
    wq, bq, wk, bk, wv, bv, wo, bo = params
    B, Nq, E = q.shape
    Di = wq.shape[1]
    Dh = Di // num_heads

    qp = q @ wq + bq
    kp = k @ wk + bk
    vp = v @ wv + bv

    def separate(x):
        b, n, c = x.shape
        return x.reshape(b, n, num_heads, c // num_heads).transpose(0, 2, 1, 3)

    qh, kh, vh = separate(qp), separate(kp), separate(vp)
    attn = jnp.einsum('bhqd,bhkd->bhqk', qh, kh)
    attn_ = attn / math.sqrt(Dh)
    p = jax.nn.softmax(attn_, axis=-1)
    o = jnp.einsum('bhqk,bhkd->bhqd', p, vh)
    o = o.transpose(0, 2, 1, 3).reshape(B, Nq, Di)
    out = o @ wo + bo
    return out, attn_


if __name__ == "__main__":
    key = jax.random.PRNGKey(0)
    kq, kk, kv, kp = jax.random.split(key, 4)

    # Small shapes consistent with the module: E=256, H=2 -> head_dim=128
    # (lane-dense head slices); Nq=20 exercises the q-padding path and
    # Nk=40 exercises the 128-padded / masked key path.
    B, Nq, Nk, E, H = 2, 20, 40, 256, 2
    q = jax.random.normal(kq, (B, Nq, E), dtype=jnp.float32)
    k = jax.random.normal(kk, (B, Nk, E), dtype=jnp.float32)
    v = jax.random.normal(kv, (B, Nk, E), dtype=jnp.float32)
    params = init_params(kp, E, H, downsample_rate=1)

    out, attn_ = attention_forward(q, k, v, params, num_heads=H)
    out = jax.block_until_ready(out)
    attn_ = jax.block_until_ready(attn_)

    ref_out, ref_attn = _reference(q, k, v, params, H)

    assert out.shape == (B, Nq, E)
    assert attn_.shape == (B, H, Nq, Nk)

    # bf16 MXU operands + approx reciprocal -> loosened tolerance
    # (expected quantization, not a bug).
    def max_rel(a, b):
        a = a.astype(jnp.float32)
        return float(jnp.max(jnp.abs(a - b)) / (jnp.max(jnp.abs(b)) + 1e-6))

    err_out = max_rel(out, ref_out)
    err_attn = max_rel(attn_, ref_attn)
    assert err_out < 5e-2, f"out error too large: {err_out}"
    assert err_attn < 5e-2, f"attn_ error too large: {err_attn}"

    print("KERNEL_OK")
</pallas_src>

<mosaic_0001>
module attributes {stable_mosaic.version = 11 : i64} {
  func.func @_linear_kernel(%arg0: i32, %arg1: memref<80x256xf32, #tpu.memory_space<vmem>>, %arg2: memref<256x256xf32, #tpu.memory_space<vmem>>, %arg3: memref<1x256xf32, #tpu.memory_space<vmem>>, %arg4: memref<80x256xbf16, #tpu.memory_space<vmem>>) attributes {dimension_semantics = [#tpu.dimension_semantics<parallel>], iteration_bounds = array<i64: 1>, scalar_prefetch = 0 : i64, scratch_operands = 0 : i64, tpu.core_type = #tpu.core_type<tc>, window_params = [{transform_indices = @transform_0, window_bounds = array<i64: 80, 256>}, {pipeline_mode = #tpu.pipeline_mode<synchronous>, transform_indices = @transform_1, window_bounds = array<i64: 256, 256>}, {pipeline_mode = #tpu.pipeline_mode<synchronous>, transform_indices = @transform_2, window_bounds = array<i64: 1, 256>}, {transform_indices = @transform_3, window_bounds = array<i64: 80, 256>}]} {
    %c0 = arith.constant 0 : index
    %c0_0 = arith.constant 0 : index
    %0 = vector.load %arg1[%c0, %c0_0] : memref<80x256xf32, #tpu.memory_space<vmem>>, vector<80x256xf32>
    %1 = arith.truncf %0 : vector<80x256xf32> to vector<80x256xbf16>
    %c0_1 = arith.constant 0 : index
    %c0_2 = arith.constant 0 : index
    %2 = vector.load %arg2[%c0_1, %c0_2] : memref<256x256xf32, #tpu.memory_space<vmem>>, vector<256x256xf32>
    %3 = arith.truncf %2 : vector<256x256xf32> to vector<256x256xbf16>
    %cst = arith.constant dense<0.000000e+00> : vector<80x256xf32>
    %4 = tpu.matmul %1, %3, %cst {dimension_numbers = #tpu.dot_dimension_numbers<[1], [0], [0], [1], [0, 0, 1, 1], [], []>} : vector<80x256xbf16>, vector<256x256xbf16>, vector<80x256xf32> -> vector<80x256xf32>
    %c0_3 = arith.constant 0 : index
    %c0_4 = arith.constant 0 : index
    %5 = vector.load %arg3[%c0_3, %c0_4] : memref<1x256xf32, #tpu.memory_space<vmem>>, vector<1x256xf32>
    %6 = vector.broadcast %5 : vector<1x256xf32> to vector<80x256xf32>
    %7 = arith.addf %4, %6 : vector<80x256xf32>
    %8 = arith.truncf %7 : vector<80x256xf32> to vector<80x256xbf16>
    %c0_5 = arith.constant 0 : index
    %c0_6 = arith.constant 0 : index
    %9 = vector.load %arg4[%c0_5, %c0_6] : memref<80x256xbf16, #tpu.memory_space<vmem>>, vector<80x256xbf16>
    tpu.vector_store %arg4[%c0_5, %c0_6], %8 {strides = array<i32>} : memref<80x256xbf16, #tpu.memory_space<vmem>>, vector<80x256xbf16>,
    return
  }
  func.func @transform_0(%arg0: i32) -> (i32, i32) {
    %c0_i32 = arith.constant 0 : i32
    %c0_i32_0 = arith.constant 0 : i32
    return %arg0, %c0_i32 : i32, i32
  }
  func.func @transform_1(%arg0: i32) -> (i32, i32) {
    %c0_i32 = arith.constant 0 : i32
    %c0_i32_0 = arith.constant 0 : i32
    %c0_i32_1 = arith.constant 0 : i32
    return %c0_i32, %c0_i32_0 : i32, i32
  }
  func.func @transform_2(%arg0: i32) -> (i32, i32) {
    %c0_i32 = arith.constant 0 : i32
    %c0_i32_0 = arith.constant 0 : i32
    %c0_i32_1 = arith.constant 0 : i32
    return %c0_i32, %c0_i32_0 : i32, i32
  }
  func.func @transform_3(%arg0: i32) -> (i32, i32) {
    %c0_i32 = arith.constant 0 : i32
    %c0_i32_0 = arith.constant 0 : i32
    return %arg0, %c0_i32 : i32, i32
  }
}

module attributes {stable_mosaic.version = 11 : i64} {
  func.func @_linear_kernel(%arg0: i32, %arg1: memref<80x256xf32, #tpu.memory_space<vmem>>, %arg2: memref<256x256xf32, #tpu.memory_space<vmem>>, %arg3: memref<1x256xf32, #tpu.memory_space<vmem>>, %arg4: memref<80x256xbf16, #tpu.memory_space<vmem>>) attributes {dimension_semantics = [#tpu.dimension_semantics<parallel>], iteration_bounds = array<i64: 1>, scalar_prefetch = 0 : i64, scratch_operands = 0 : i64, tpu.core_type = #tpu.core_type<tc>, window_params = [{transform_indices = @transform_0, window_bounds = array<i64: 80, 256>}, {pipeline_mode = #tpu.pipeline_mode<synchronous>, transform_indices = @transform_1, window_bounds = array<i64: 256, 256>}, {pipeline_mode = #tpu.pipeline_mode<synchronous>, transform_indices = @transform_2, window_bounds = array<i64: 1, 256>}, {transform_indices = @transform_3, window_bounds = array<i64: 80, 256>}]} {
    %c0 = arith.constant 0 : index
    %c0_0 = arith.constant 0 : index
    %0 = vector.load %arg1[%c0, %c0_0] : memref<80x256xf32, #tpu.memory_space<vmem>>, vector<80x256xf32>
    %1 = arith.truncf %0 : vector<80x256xf32> to vector<80x256xbf16>
    %c0_1 = arith.constant 0 : index
    %c0_2 = arith.constant 0 : index
    %2 = vector.load %arg2[%c0_1, %c0_2] : memref<256x256xf32, #tpu.memory_space<vmem>>, vector<256x256xf32>
    %3 = arith.truncf %2 : vector<256x256xf32> to vector<256x256xbf16>
    %cst = arith.constant dense<0.000000e+00> : vector<80x256xf32>
    %4 = tpu.matmul %1, %3, %cst {dimension_numbers = #tpu.dot_dimension_numbers<[1], [0], [0], [1], [0, 0, 1, 1], [], []>} : vector<80x256xbf16>, vector<256x256xbf16>, vector<80x256xf32> -> vector<80x256xf32>
    %c0_3 = arith.constant 0 : index
    %c0_4 = arith.constant 0 : index
    %5 = vector.load %arg3[%c0_3, %c0_4] : memref<1x256xf32, #tpu.memory_space<vmem>>, vector<1x256xf32>
    %6 = vector.broadcast %5 : vector<1x256xf32> to vector<80x256xf32>
    %7 = arith.addf %4, %6 : vector<80x256xf32>
    %8 = arith.truncf %7 : vector<80x256xf32> to vector<80x256xbf16>
    %c0_5 = arith.constant 0 : index
    %c0_6 = arith.constant 0 : index
    %9 = vector.load %arg4[%c0_5, %c0_6] : memref<80x256xbf16, #tpu.memory_space<vmem>>, vector<80x256xbf16>
    tpu.vector_store %arg4[%c0_5, %c0_6], %8 {strides = array<i32>} : memref<80x256xbf16, #tpu.memory_space<vmem>>, vector<80x256xbf16>,
    return
  }
  func.func @transform_0(%arg0: i32) -> (i32, i32) {
    %c0_i32 = arith.constant 0 : i32
    %c0_i32_0 = arith.constant 0 : i32
    return %arg0, %c0_i32 : i32, i32
  }
  func.func @transform_1(%arg0: i32) -> (i32, i32) {
    %c0_i32 = arith.constant 0 : i32
    %c0_i32_0 = arith.constant 0 : i32
    %c0_i32_1 = arith.constant 0 : i32
    return %c0_i32, %c0_i32_0 : i32, i32
  }
  func.func @transform_2(%arg0: i32) -> (i32, i32) {
    %c0_i32 = arith.constant 0 : i32
    %c0_i32_0 = arith.constant 0 : i32
    %c0_i32_1 = arith.constant 0 : i32
    return %c0_i32, %c0_i32_0 : i32, i32
  }
  func.func @transform_3(%arg0: i32) -> (i32, i32) {
    %c0_i32 = arith.constant 0 : i32
    %c0_i32_0 = arith.constant 0 : i32
    return %arg0, %c0_i32 : i32, i32
  }
}

module attributes {stable_mosaic.version = 11 : i64} {
  func.func @_linear_kernel(%arg0: i32, %arg1: memref<40x256xf32, #tpu.memory_space<vmem>>, %arg2: memref<256x256xf32, #tpu.memory_space<vmem>>, %arg3: memref<1x256xf32, #tpu.memory_space<vmem>>, %arg4: memref<40x256xbf16, #tpu.memory_space<vmem>>) attributes {dimension_semantics = [#tpu.dimension_semantics<parallel>], iteration_bounds = array<i64: 1>, scalar_prefetch = 0 : i64, scratch_operands = 0 : i64, tpu.core_type = #tpu.core_type<tc>, window_params = [{transform_indices = @transform_0, window_bounds = array<i64: 40, 256>}, {pipeline_mode = #tpu.pipeline_mode<synchronous>, transform_indices = @transform_1, window_bounds = array<i64: 256, 256>}, {pipeline_mode = #tpu.pipeline_mode<synchronous>, transform_indices = @transform_2, window_bounds = array<i64: 1, 256>}, {transform_indices = @transform_3, window_bounds = array<i64: 40, 256>}]} {
    %c0 = arith.constant 0 : index
    %c0_0 = arith.constant 0 : index
    %0 = vector.load %arg1[%c0, %c0_0] : memref<40x256xf32, #tpu.memory_space<vmem>>, vector<40x256xf32>
    %1 = arith.truncf %0 : vector<40x256xf32> to vector<40x256xbf16>
    %c0_1 = arith.constant 0 : index
    %c0_2 = arith.constant 0 : index
    %2 = vector.load %arg2[%c0_1, %c0_2] : memref<256x256xf32, #tpu.memory_space<vmem>>, vector<256x256xf32>
    %3 = arith.truncf %2 : vector<256x256xf32> to vector<256x256xbf16>
    %cst = arith.constant dense<0.000000e+00> : vector<40x256xf32>
    %4 = tpu.matmul %1, %3, %cst {dimension_numbers = #tpu.dot_dimension_numbers<[1], [0], [0], [1], [0, 0, 1, 1], [], []>} : vector<40x256xbf16>, vector<256x256xbf16>, vector<40x256xf32> -> vector<40x256xf32>
    %c0_3 = arith.constant 0 : index
    %c0_4 = arith.constant 0 : index
    %5 = vector.load %arg3[%c0_3, %c0_4] : memref<1x256xf32, #tpu.memory_space<vmem>>, vector<1x256xf32>
    %6 = vector.broadcast %5 : vector<1x256xf32> to vector<40x256xf32>
    %7 = arith.addf %4, %6 : vector<40x256xf32>
    %8 = arith.truncf %7 : vector<40x256xf32> to vector<40x256xbf16>
    %c0_5 = arith.constant 0 : index
    %c0_6 = arith.constant 0 : index
    %9 = vector.load %arg4[%c0_5, %c0_6] : memref<40x256xbf16, #tpu.memory_space<vmem>>, vector<40x256xbf16>
    tpu.vector_store %arg4[%c0_5, %c0_6], %8 {strides = array<i32>} : memref<40x256xbf16, #tpu.memory_space<vmem>>, vector<40x256xbf16>,
    return
  }
  func.func @transform_0(%arg0: i32) -> (i32, i32) {
    %c0_i32 = arith.constant 0 : i32
    %c0_i32_0 = arith.constant 0 : i32
    return %arg0, %c0_i32 : i32, i32
  }
  func.func @transform_1(%arg0: i32) -> (i32, i32) {
    %c0_i32 = arith.constant 0 : i32
    %c0_i32_0 = arith.constant 0 : i32
    %c0_i32_1 = arith.constant 0 : i32
    return %c0_i32, %c0_i32_0 : i32, i32
  }
  func.func @transform_2(%arg0: i32) -> (i32, i32) {
    %c0_i32 = arith.constant 0 : i32
    %c0_i32_0 = arith.constant 0 : i32
    %c0_i32_1 = arith.constant 0 : i32
    return %c0_i32, %c0_i32_0 : i32, i32
  }
  func.func @transform_3(%arg0: i32) -> (i32, i32) {
    %c0_i32 = arith.constant 0 : i32
    %c0_i32_0 = arith.constant 0 : i32
    return %arg0, %c0_i32 : i32, i32
  }
}

module attributes {stable_mosaic.version = 11 : i64} {
  func.func @_mha_kernel(%arg0: i32, %arg1: i32, %arg2: i32, %arg3: memref<1x24x128xbf16, #tpu.memory_space<vmem>>, %arg4: memref<1x128x128xbf16, #tpu.memory_space<vmem>>, %arg5: memref<1x128x128xbf16, #tpu.memory_space<vmem>>, %arg6: memref<1x24x128xbf16, #tpu.memory_space<vmem>>, %arg7: memref<1x1x24x128xf32, #tpu.memory_space<vmem>>) attributes {dimension_semantics = [#tpu.dimension_semantics<parallel>, #tpu.dimension_semantics<parallel>, #tpu.dimension_semantics<parallel>], iteration_bounds = array<i64: 2, 2, 1>, scalar_prefetch = 0 : i64, scratch_operands = 0 : i64, tpu.core_type = #tpu.core_type<tc>, window_params = [{transform_indices = @transform_0, window_bounds = array<i64: 1, 24, 128>}, {transform_indices = @transform_1, window_bounds = array<i64: 1, 128, 128>}, {transform_indices = @transform_2, window_bounds = array<i64: 1, 128, 128>}, {transform_indices = @transform_3, window_bounds = array<i64: 1, 24, 128>}, {transform_indices = @transform_4, window_bounds = array<i64: 1, 1, 24, 128>}]} {
    %c0 = arith.constant 0 : index
    %c0_0 = arith.constant 0 : index
    %c0_1 = arith.constant 0 : index
    %0 = vector.load %arg3[%c0, %c0_0, %c0_1] : memref<1x24x128xbf16, #tpu.memory_space<vmem>>, vector<1x24x128xbf16>
    %1 = vector.shape_cast %0 : vector<1x24x128xbf16> to vector<24x128xbf16>
    %c0_2 = arith.constant 0 : index
    %c0_3 = arith.constant 0 : index
    %c0_4 = arith.constant 0 : index
    %2 = vector.load %arg4[%c0_2, %c0_3, %c0_4] : memref<1x128x128xbf16, #tpu.memory_space<vmem>>, vector<1x128x128xbf16>
    %3 = vector.shape_cast %2 : vector<1x128x128xbf16> to vector<128x128xbf16>
    %c0_5 = arith.constant 0 : index
    %c0_6 = arith.constant 0 : index
    %c0_7 = arith.constant 0 : index
    %4 = vector.load %arg5[%c0_5, %c0_6, %c0_7] : memref<1x128x128xbf16, #tpu.memory_space<vmem>>, vector<1x128x128xbf16>
    %5 = vector.shape_cast %4 : vector<1x128x128xbf16> to vector<128x128xbf16>
    %cst = arith.constant dense<0.000000e+00> : vector<24x128xf32>
    %6 = tpu.matmul %1, %3, %cst {dimension_numbers = #tpu.dot_dimension_numbers<[1], [1], [0], [0], [0, 0, 1, 0], [], []>} : vector<24x128xbf16>, vector<128x128xbf16>, vector<24x128xf32> -> vector<24x128xf32>
    %cst_8 = arith.constant 0.0883883461 : f32
    %7 = vector.broadcast %cst_8 : f32 to vector<24x128xf32>
    %8 = arith.mulf %6, %7 : vector<24x128xf32>
    %c0_9 = arith.constant 0 : index
    %c0_10 = arith.constant 0 : index
    %c0_11 = arith.constant 0 : index
    %c0_12 = arith.constant 0 : index
    %9 = vector.load %arg7[%c0_9, %c0_10, %c0_11, %c0_12] : memref<1x1x24x128xf32, #tpu.memory_space<vmem>>, vector<1x1x24x128xf32>
    %10 = vector.shape_cast %9 : vector<1x1x24x128xf32> to vector<24x128xf32>
    %11 = vector.shape_cast %8 : vector<24x128xf32> to vector<1x1x24x128xf32>
    tpu.vector_store %arg7[%c0_9, %c0_10, %c0_11, %c0_12], %11 {strides = array<i32>} : memref<1x1x24x128xf32, #tpu.memory_space<vmem>>, vector<1x1x24x128xf32>,
    %12 = tpu.iota {dimensions = array<i32: 1>} : vector<24x128xi32>
    %c40_i32 = arith.constant 40 : i32
    %13 = vector.broadcast %c40_i32 : i32 to vector<24x128xi32>
    %14 = arith.cmpi slt, %12, %13 : vector<24x128xi32>
    %cst_13 = arith.constant -1.000000e+30 : f32
    %15 = vector.broadcast %cst_13 : f32 to vector<24x128xf32>
    %16 = arith.select %14, %8, %15 : vector<24x128xi1>, vector<24x128xf32>
    %cst_14 = arith.constant dense<0xFF800000> : vector<24xf32>
    %17 = vector.multi_reduction <maximumf>, %16, %cst_14 [1] : vector<24x128xf32> to vector<24xf32>
    %18 = vector.shape_cast %17 : vector<24xf32> to vector<24x1xf32>
    %19 = vector.broadcast %18 : vector<24x1xf32> to vector<24x128xf32>
    %20 = arith.subf %16, %19 : vector<24x128xf32>
    %21 = math.exp %20 : vector<24x128xf32>
    %cst_15 = arith.constant dense<0.000000e+00> : vector<24xf32>
    %22 = vector.multi_reduction <add>, %21, %cst_15 [1] : vector<24x128xf32> to vector<24xf32>
    %23 = vector.shape_cast %22 : vector<24xf32> to vector<24x1xf32>
    %24 = tpu.reciprocal %23 {approx = true} : vector<24x1xf32> -> vector<24x1xf32>
    %25 = vector.broadcast %24 : vector<24x1xf32> to vector<24x128xf32>
    %26 = arith.mulf %21, %25 : vector<24x128xf32>
    %27 = arith.truncf %26 : vector<24x128xf32> to vector<24x128xbf16>
    %cst_16 = arith.constant dense<0.000000e+00> : vector<24x128xf32>
    %28 = tpu.matmul %27, %5, %cst_16 {dimension_numbers = #tpu.dot_dimension_numbers<[1], [0], [0], [1], [0, 0, 1, 1], [], []>} : vector<24x128xbf16>, vector<128x128xbf16>, vector<24x128xf32> -> vector<24x128xf32>
    %29 = arith.truncf %28 : vector<24x128xf32> to vector<24x128xbf16>
    %c0_17 = arith.constant 0 : index
    %c0_18 = arith.constant 0 : index
    %c0_19 = arith.constant 0 : index
    %30 = vector.load %arg6[%c0_17, %c0_18, %c0_19] : memref<1x24x128xbf16, #tpu.memory_space<vmem>>, vector<1x24x128xbf16>
    %31 = vector.shape_cast %30 : vector<1x24x128xbf16> to vector<24x128xbf16>
    %32 = vector.shape_cast %29 : vector<24x128xbf16> to vector<1x24x128xbf16>
    tpu.vector_store %arg6[%c0_17, %c0_18, %c0_19], %32 {strides = array<i32>} : memref<1x24x128xbf16, #tpu.memory_space<vmem>>, vector<1x24x128xbf16>,
    return
  }
  func.func @transform_0(%arg0: i32, %arg1: i32, %arg2: i32) -> (i32, i32, i32) {
    %c0_i32 = arith.constant 0 : i32
    return %arg0, %arg2, %arg1 : i32, i32, i32
  }
  func.func @transform_1(%arg0: i32, %arg1: i32, %arg2: i32) -> (i32, i32, i32) {
    %c0_i32 = arith.constant 0 : i32
    %c0_i32_0 = arith.constant 0 : i32
    return %arg0, %c0_i32, %arg1 : i32, i32, i32
  }
  func.func @transform_2(%arg0: i32, %arg1: i32, %arg2: i32) -> (i32, i32, i32) {
    %c0_i32 = arith.constant 0 : i32
    %c0_i32_0 = arith.constant 0 : i32
    return %arg0, %c0_i32, %arg1 : i32, i32, i32
  }
  func.func @transform_3(%arg0: i32, %arg1: i32, %arg2: i32) -> (i32, i32, i32) {
    %c0_i32 = arith.constant 0 : i32
    return %arg0, %arg2, %arg1 : i32, i32, i32
  }
  func.func @transform_4(%arg0: i32, %arg1: i32, %arg2: i32) -> (i32, i32, i32, i32) {
    %c0_i32 = arith.constant 0 : i32
    %c0_i32_0 = arith.constant 0 : i32
    return %arg0, %arg1, %arg2, %c0_i32 : i32, i32, i32, i32
  }
}

module attributes {stable_mosaic.version = 11 : i64} {
  func.func @_linear_kernel(%arg0: i32, %arg1: memref<40x256xbf16, #tpu.memory_space<vmem>>, %arg2: memref<256x256xf32, #tpu.memory_space<vmem>>, %arg3: memref<1x256xf32, #tpu.memory_space<vmem>>, %arg4: memref<40x256xf32, #tpu.memory_space<vmem>>) attributes {dimension_semantics = [#tpu.dimension_semantics<parallel>], iteration_bounds = array<i64: 1>, scalar_prefetch = 0 : i64, scratch_operands = 0 : i64, tpu.core_type = #tpu.core_type<tc>, window_params = [{transform_indices = @transform_0, window_bounds = array<i64: 40, 256>}, {pipeline_mode = #tpu.pipeline_mode<synchronous>, transform_indices = @transform_1, window_bounds = array<i64: 256, 256>}, {pipeline_mode = #tpu.pipeline_mode<synchronous>, transform_indices = @transform_2, window_bounds = array<i64: 1, 256>}, {transform_indices = @transform_3, window_bounds = array<i64: 40, 256>}]} {
    %c0 = arith.constant 0 : index
    %c0_0 = arith.constant 0 : index
    %0 = vector.load %arg1[%c0, %c0_0] : memref<40x256xbf16, #tpu.memory_space<vmem>>, vector<40x256xbf16>
    %c0_1 = arith.constant 0 : index
    %c0_2 = arith.constant 0 : index
    %1 = vector.load %arg2[%c0_1, %c0_2] : memref<256x256xf32, #tpu.memory_space<vmem>>, vector<256x256xf32>
    %2 = arith.truncf %1 : vector<256x256xf32> to vector<256x256xbf16>
    %cst = arith.constant dense<0.000000e+00> : vector<40x256xf32>
    %3 = tpu.matmul %0, %2, %cst {dimension_numbers = #tpu.dot_dimension_numbers<[1], [0], [0], [1], [0, 0, 1, 1], [], []>} : vector<40x256xbf16>, vector<256x256xbf16>, vector<40x256xf32> -> vector<40x256xf32>
    %c0_3 = arith.constant 0 : index
    %c0_4 = arith.constant 0 : index
    %4 = vector.load %arg3[%c0_3, %c0_4] : memref<1x256xf32, #tpu.memory_space<vmem>>, vector<1x256xf32>
    %5 = vector.broadcast %4 : vector<1x256xf32> to vector<40x256xf32>
    %6 = arith.addf %3, %5 : vector<40x256xf32>
    %c0_5 = arith.constant 0 : index
    %c0_6 = arith.constant 0 : index
    %7 = vector.load %arg4[%c0_5, %c0_6] : memref<40x256xf32, #tpu.memory_space<vmem>>, vector<40x256xf32>
    tpu.vector_store %arg4[%c0_5, %c0_6], %6 {strides = array<i32>} : memref<40x256xf32, #tpu.memory_space<vmem>>, vector<40x256xf32>,
    return
  }
  func.func @transform_0(%arg0: i32) -> (i32, i32) {
    %c0_i32 = arith.constant 0 : i32
    %c0_i32_0 = arith.constant 0 : i32
    return %arg0, %c0_i32 : i32, i32
  }
  func.func @transform_1(%arg0: i32) -> (i32, i32) {
    %c0_i32 = arith.constant 0 : i32
    %c0_i32_0 = arith.constant 0 : i32
    %c0_i32_1 = arith.constant 0 : i32
    return %c0_i32, %c0_i32_0 : i32, i32
  }
  func.func @transform_2(%arg0: i32) -> (i32, i32) {
    %c0_i32 = arith.constant 0 : i32
    %c0_i32_0 = arith.constant 0 : i32
    %c0_i32_1 = arith.constant 0 : i32
    return %c0_i32, %c0_i32_0 : i32, i32
  }
  func.func @transform_3(%arg0: i32) -> (i32, i32) {
    %c0_i32 = arith.constant 0 : i32
    %c0_i32_0 = arith.constant 0 : i32
    return %arg0, %c0_i32 : i32, i32
  }
}

</mosaic_0001>

<bundles_post_ra>
// kernel: attention_forward.7
= control target key start
LH: loop header
LB: loop body
LE: loop exit
PB: predicated region body
PF: predicated region fallthrough
CT: control target
= control target key end

     0   :  { %s666_s1 = inlined_call_operand.vmem [shape: f32[256,256], index: 1, kind: input, shape index: {}]   ;;  %s667_s0 = inlined_call_operand.vmem [shape: f32[80,256], index: 0, kind: input, shape index: {}]   ;;  %s668_s2 = inlined_call_operand.vmem [shape: f32[1,256], index: 2, kind: input, shape index: {}]   ;;  %s669_s3 = inlined_call_operand.vmem [shape: bf16[80,256], index: 3, kind: output, shape index: {}]  }
   0x1   :  { %v45_v0 = vld [vmem:[%s666_s1 + $0x8] sm:$0xff]  ;;  %v47_v1 = vld [vmem:[%s666_s1 + $0x18] sm:$0xff]  ;;  %v44_v2 = vld [vmem:[%s666_s1] sm:$0xff] }
   0x2   :  { %v109_v3 = vpack.c.bf16 %v47_v1, %v45_v0  ;;  %v46_v4 = vld [vmem:[%s666_s1 + $0x10] sm:$0xff]  ;;  %v49_v5 = vld [vmem:[%s666_s1 + $0x28] sm:$0xff]  ;;  %v51_v6 = vld [vmem:[%s666_s1 + $0x38] sm:$0xff] }
   0x3   :  { %v108_v7 = vpack.c.bf16 %v46_v4, %v44_v2  ;;  %v111_v8 = vpack.c.bf16 %v51_v6, %v49_v5  ;;  %v48_v9 = vld [vmem:[%s666_s1 + $0x20] sm:$0xff]  ;;  %v50_v10 = vld [vmem:[%s666_s1 + $0x30] sm:$0xff]  ;;  %v53_v11 = vld [vmem:[%s666_s1 + $0x48] sm:$0xff] }
   0x4   :  { %152 = vmatprep.subr.bf16.mxu0 %v109_v3  ;;  %329 = vmatprep.subr.bf16.mxu1 %v109_v3  ;;  %v55_v12 = vld [vmem:[%s666_s1 + $0x58] sm:$0xff]  ;;  %v110_v13 = vpack.c.bf16 %v50_v10, %v48_v9  ;;  %v52_v15 = vld [vmem:[%s666_s1 + $0x40] sm:$0xff]  ;;  %v54_v16 = vld [vmem:[%s666_s1 + $0x50] sm:$0xff] }
   0x5   :  { %153 = vmatpush1.bf16.msra.mxu0 %v108_v7  ;;  %345 = vmatpush1.bf16.msra.mxu1 %v108_v7  ;;  %v113_v14 = vpack.c.bf16 %v55_v12, %v53_v11  ;;  %v57_v17 = vld [vmem:[%s666_s1 + $0x68] sm:$0xff]  ;;  %v59_v18 = vld [vmem:[%s666_s1 + $0x78] sm:$0xff]  ;;  %v112_v19 = vpack.c.bf16 %v54_v16, %v52_v15  ;;  %v56_v21 = vld [vmem:[%s666_s1 + $0x60] sm:$0xff] }
   0x6   :  { %154 = vmatprep.subr.bf16.mxu0 %v111_v8  ;;  %330 = vmatprep.subr.bf16.mxu1 %v111_v8  ;;  %v115_v20 = vpack.c.bf16 %v59_v18, %v57_v17  ;;  %v58_v22 = vld [vmem:[%s666_s1 + $0x70] sm:$0xff]  ;;  %v61_v23 = vld [vmem:[%s666_s1 + $0x88] sm:$0xff]  ;;  %v63_v24 = vld [vmem:[%s666_s1 + $0x98] sm:$0xff] }
   0x7   :  { %v114_v25 = vpack.c.bf16 %v58_v22, %v56_v21  ;;  %v117_v26 = vpack.c.bf16 %v63_v24, %v61_v23  ;;  %v60_v27 = vld [vmem:[%s666_s1 + $0x80] sm:$0xff]  ;;  %v62_v28 = vld [vmem:[%s666_s1 + $0x90] sm:$0xff]  ;;  %v65_v29 = vld [vmem:[%s666_s1 + $0xa8] sm:$0xff] }
   0x8   :  { %v67_v30 = vld [vmem:[%s666_s1 + $0xb8] sm:$0xff]  ;;  %v116_v31 = vpack.c.bf16 %v62_v28, %v60_v27  ;;  %v64_v33 = vld [vmem:[%s666_s1 + $0xa0] sm:$0xff]  ;;  %v66_v34 = vld [vmem:[%s666_s1 + $0xb0] sm:$0xff] }
   0x9   :  { %155 = vmatpush1.bf16.msra.mxu0 %v110_v13  ;;  %346 = vmatpush1.bf16.msra.mxu1 %v110_v13  ;;  %v119_v32 = vpack.c.bf16 %v67_v30, %v65_v29  ;;  %v69_v35 = vld [vmem:[%s666_s1 + $0xc8] sm:$0xff]  ;;  %v71_v36 = vld [vmem:[%s666_s1 + $0xd8] sm:$0xff]  ;;  %v118_v37 = vpack.c.bf16 %v66_v34, %v64_v33  ;;  %v68_v38 = vld [vmem:[%s666_s1 + $0xc0] sm:$0xff] }
   0xa   :  { %156 = vmatprep.subr.bf16.mxu0 %v113_v14  ;;  %331 = vmatprep.subr.bf16.mxu1 %v113_v14  ;;  %v121_v39 = vpack.c.bf16 %v71_v36, %v69_v35  ;;  %v70_v40 = vld [vmem:[%s666_s1 + $0xd0] sm:$0xff]  ;;  %v15_v41 = vld [vmem:[%s667_s0 + $0x8] sm:$0xff]  ;;  %v17_v42 = vld [vmem:[%s667_s0 + $0x18] sm:$0xff] }
   0xb   :  { %v73_v43 = vld [vmem:[%s666_s1 + $0xe8] sm:$0xff]  ;;  %v75_v44 = vld [vmem:[%s666_s1 + $0xf8] sm:$0xff]  ;;  %v35_v45 = vpack.c.bf16 %v17_v42, %v15_v41  ;;  %v120_v48 = vpack.c.bf16 %v70_v40, %v68_v38  ;;  %v72_v51 = vld [vmem:[%s666_s1 + $0xe0] sm:$0xff] }
   0xc   :  { %v27_v46 = vld [vmem:[%s667_s0 + $0x68] sm:$0xff]  ;;  %v29_v47 = vld [vmem:[%s667_s0 + $0x78] sm:$0xff]  ;;  %v123_v50 = vpack.c.bf16 %v75_v44, %v73_v43  ;;  %v74_v52 = vld [vmem:[%s666_s1 + $0xf0] sm:$0xff] }
   0xd   :  { %157 = vmatpush1.bf16.msra.mxu0 %v112_v19  ;;  %347 = vmatpush1.bf16.msra.mxu1 %v112_v19  ;;  %v41_v49 = vpack.c.bf16 %v29_v47, %v27_v46  ;;  %v77_v53 = vld [vmem:[%s666_s1 + $0x108] sm:$0xff]  ;;  %v79_v54 = vld [vmem:[%s666_s1 + $0x118] sm:$0xff]  ;;  %v122_v55 = vpack.c.bf16 %v74_v52, %v72_v51  ;;  %v76_v57 = vld [vmem:[%s666_s1 + $0x100] sm:$0xff] }
   0xe   :  { %158 = vmatprep.subr.bf16.mxu0 %v115_v20  ;;  %332 = vmatprep.subr.bf16.mxu1 %v115_v20  ;;  %v125_v56 = vpack.c.bf16 %v79_v54, %v77_v53  ;;  %v78_v58 = vld [vmem:[%s666_s1 + $0x110] sm:$0xff]  ;;  %v81_v59 = vld [vmem:[%s666_s1 + $0x128] sm:$0xff]  ;;  %v83_v60 = vld [vmem:[%s666_s1 + $0x138] sm:$0xff] }
   0xf   :  { %184 = vmatprep.mubr.bf16.mxu0 %v35_v45  ;;  %214 = vmatprep.mubr.bf16.mxu1 %v41_v49  ;;  %v124_v61 = vpack.c.bf16 %v78_v58, %v76_v57  ;;  %v127_v62 = vpack.c.bf16 %v83_v60, %v81_v59  ;;  %v80_v63 = vld [vmem:[%s666_s1 + $0x120] sm:$0xff]  ;;  %v82_v0 = vld [vmem:[%s666_s1 + $0x130] sm:$0xff]  ;;  %v85_v1 = vld [vmem:[%s666_s1 + $0x148] sm:$0xff] }
  0x10   :  { %v87_v2 = vld [vmem:[%s666_s1 + $0x158] sm:$0xff]  ;;  %v126_v3 = vpack.c.bf16 %v82_v0, %v80_v63  ;;  %v84_v5 = vld [vmem:[%s666_s1 + $0x140] sm:$0xff]  ;;  %v86_v6 = vld [vmem:[%s666_s1 + $0x150] sm:$0xff] }
  0x11   :  { %159 = vmatpush1.bf16.msra.mxu0 %v114_v25  ;;  %348 = vmatpush1.bf16.msra.mxu1 %v114_v25  ;;  %v129_v4 = vpack.c.bf16 %v87_v2, %v85_v1  ;;  %v89_v7 = vld [vmem:[%s666_s1 + $0x168] sm:$0xff]  ;;  %v91_v8 = vld [vmem:[%s666_s1 + $0x178] sm:$0xff]  ;;  %v128_v9 = vpack.c.bf16 %v86_v6, %v84_v5  ;;  %v88_v11 = vld [vmem:[%s666_s1 + $0x160] sm:$0xff] }
  0x12   :  { %160 = vmatprep.subr.bf16.mxu0 %v117_v26  ;;  %333 = vmatprep.subr.bf16.mxu1 %v117_v26  ;;  %v131_v10 = vpack.c.bf16 %v91_v8, %v89_v7  ;;  %v90_v12 = vld [vmem:[%s666_s1 + $0x170] sm:$0xff]  ;;  %v93_v13 = vld [vmem:[%s666_s1 + $0x188] sm:$0xff]  ;;  %v95_v14 = vld [vmem:[%s666_s1 + $0x198] sm:$0xff] }
  0x13   :  { %v130_v15 = vpack.c.bf16 %v90_v12, %v88_v11  ;;  %v133_v16 = vpack.c.bf16 %v95_v14, %v93_v13  ;;  %v92_v17 = vld [vmem:[%s666_s1 + $0x180] sm:$0xff]  ;;  %v94_v18 = vld [vmem:[%s666_s1 + $0x190] sm:$0xff]  ;;  %v97_v19 = vld [vmem:[%s666_s1 + $0x1a8] sm:$0xff] }
  0x14   :  { %v99_v20 = vld [vmem:[%s666_s1 + $0x1b8] sm:$0xff]  ;;  %v132_v21 = vpack.c.bf16 %v94_v18, %v92_v17  ;;  %v96_v23 = vld [vmem:[%s666_s1 + $0x1a0] sm:$0xff]  ;;  %v98_v24 = vld [vmem:[%s666_s1 + $0x1b0] sm:$0xff] }
  0x15   :  { %161 = vmatpush1.bf16.msra.mxu0 %v116_v31  ;;  %349 = vmatpush1.bf16.msra.mxu1 %v116_v31  ;;  %v135_v22 = vpack.c.bf16 %v99_v20, %v97_v19  ;;  %v101_v25 = vld [vmem:[%s666_s1 + $0x1c8] sm:$0xff]  ;;  %v103_v26 = vld [vmem:[%s666_s1 + $0x1d8] sm:$0xff]  ;;  %v134_v27 = vpack.c.bf16 %v98_v24, %v96_v23  ;;  %v100_v29 = vld [vmem:[%s666_s1 + $0x1c0] sm:$0xff] }
  0x16   :  { %162 = vmatprep.subr.bf16.mxu0 %v119_v32  ;;  %334 = vmatprep.subr.bf16.mxu1 %v119_v32  ;;  %v137_v28 = vpack.c.bf16 %v103_v26, %v101_v25  ;;  %v102_v30 = vld [vmem:[%s666_s1 + $0x1d0] sm:$0xff]  ;;  %v105_v31 = vld [vmem:[%s666_s1 + $0x1e8] sm:$0xff]  ;;  %v107_v32 = vld [vmem:[%s666_s1 + $0x1f8] sm:$0xff] }
  0x17   :  { %v136_v33 = vpack.c.bf16 %v102_v30, %v100_v29  ;;  %v139_v34 = vpack.c.bf16 %v107_v32, %v105_v31  ;;  %v104_v35 = vld [vmem:[%s666_s1 + $0x1e0] sm:$0xff]  ;;  %v106_v36 = vld [vmem:[%s666_s1 + $0x1f0] sm:$0xff]  ;;  %v19_v42 = vld [vmem:[%s667_s0 + $0x28] sm:$0xff] }
  0x18   :  { %v16_v38 = vld [vmem:[%s667_s0 + $0x10] sm:$0xff]  ;;  %v26_v40 = vld [vmem:[%s667_s0 + $0x60] sm:$0xff]  ;;  %v21_v43 = vld [vmem:[%s667_s0 + $0x38] sm:$0xff] }
  0x19   :  { %163 = vmatpush1.bf16.msra.mxu0 %v118_v37  ;;  %350 = vmatpush1.bf16.msra.mxu1 %v118_v37  ;;  %v14_v37 = vld [vmem:[%s667_s0] sm:$0xff]  ;;  %v28_v41 = vld [vmem:[%s667_s0 + $0x70] sm:$0xff]  ;;  %v31_v44 = vld [vmem:[%s667_s0 + $0x88] sm:$0xff] }
  0x1a   :  { %164 = vmatprep.subr.bf16.mxu0 %v121_v39  ;;  %335 = vmatprep.subr.bf16.mxu1 %v121_v39  ;;  %v138_v39 = vpack.c.bf16 %v106_v36, %v104_v35  ;;  %v33_v45 = vld [vmem:[%s667_s0 + $0x98] sm:$0xff]  ;;  %v34_v46 = vpack.c.bf16 %v16_v38, %v14_v37  ;;  %v40_v47 = vpack.c.bf16 %v28_v41, %v26_v40  ;;  %v20_v51 = vld [vmem:[%s667_s0 + $0x30] sm:$0xff]  ;;  %v30_v52 = vld [vmem:[%s667_s0 + $0x80] sm:$0xff] }
  0x1b   :  { %v43_v49 = vpack.c.bf16 %v33_v45, %v31_v44  ;;  %v32_v53 = vld [vmem:[%s667_s0 + $0x90] sm:$0xff]  ;;  %v23_v54 = vld [vmem:[%s667_s0 + $0x48] sm:$0xff]  ;;  %v22_v59 = vld [vmem:[%s667_s0 + $0x40] sm:$0xff] }
  0x1c   :  { %v42_v57 = vpack.c.bf16 %v32_v53, %v30_v52  ;;  %v24_v60 = vld [vmem:[%s667_s0 + $0x50] sm:$0xff]  ;;  %v140_v1 = vld [vmem:[%s668_s2] sm:$0x3] }
  0x1d   :  { %165 = vmatpush1.bf16.msra.mxu0 %v120_v48  ;;  %351 = vmatpush1.bf16.msra.mxu1 %v120_v48  ;;  %v37_v48 = vpack.c.bf16 %v21_v43, %v19_v42 }
  0x1e   :  { %166 = vmatprep.subr.bf16.mxu0 %v123_v50  ;;  %336 = vmatprep.subr.bf16.mxu1 %v123_v50  ;;  %v18_v50 = vld [vmem:[%s667_s0 + $0x20] sm:$0xff] }
  0x21   :  { %167 = vmatpush1.bf16.msra.mxu0 %v122_v55  ;;  %352 = vmatpush1.bf16.msra.mxu1 %v122_v55  ;;  %v25_v55 = vld [vmem:[%s667_s0 + $0x58] sm:$0xff] }
  0x22   :  { %168 = vmatprep.subr.bf16.mxu0 %v125_v56  ;;  %337 = vmatprep.subr.bf16.mxu1 %v125_v56  ;;  %v36_v56 = vpack.c.bf16 %v20_v51, %v18_v50  ;;  %v39_v58 = vpack.c.bf16 %v25_v55, %v23_v54 }
  0x25   :  { %169 = vmatpush1.bf16.msra.mxu0 %v124_v61  ;;  %353 = vmatpush1.bf16.msra.mxu1 %v124_v61  ;;  %v38_v61 = vpack.c.bf16 %v24_v60, %v22_v59 }
  0x26   :  { %170 = vmatprep.subr.bf16.mxu0 %v127_v62  ;;  %338 = vmatprep.subr.bf16.mxu1 %v127_v62  ;;  %v142_v62 = vlaneseq }
  0x28   :  { %v143_v63 = vshrl.u32 %v142_v62, 7 }
  0x29   :  { %171 = vmatpush1.bf16.msra.mxu0 %v126_v3  ;;  %354 = vmatpush1.bf16.msra.mxu1 %v126_v3 }
  0x2a   :  { %172 = vmatprep.subr.bf16.mxu0 %v129_v4  ;;  %339 = vmatprep.subr.bf16.mxu1 %v129_v4  ;;  %v144_v0 = vsub.s32 0, %v143_v63  ;;  %v148_v2 = vsub.s32 1, %v143_v63 }
  0x2c   :  { %v145_v3 = vrot.slane %v140_v1, %v144_v0  ;;  %v149_v4 = vrot.slane %v140_v1, %v148_v2 }
  0x2d   :  { %173 = vmatpush1.bf16.msra.mxu0 %v128_v9  ;;  %355 = vmatpush1.bf16.msra.mxu1 %v128_v9 }
  0x2e   :  { %174 = vmatprep.subr.bf16.mxu0 %v131_v10  ;;  %340 = vmatprep.subr.bf16.mxu1 %v131_v10 }
  0x31   :  { %175 = vmatpush1.bf16.msra.mxu0 %v130_v15  ;;  %356 = vmatpush1.bf16.msra.mxu1 %v130_v15 }
  0x32   :  { %176 = vmatprep.subr.bf16.mxu0 %v133_v16  ;;  %341 = vmatprep.subr.bf16.mxu1 %v133_v16 }
  0x35   :  { %177 = vmatpush1.bf16.msra.mxu0 %v132_v21  ;;  %357 = vmatpush1.bf16.msra.mxu1 %v132_v21 }
  0x36   :  { %178 = vmatprep.subr.bf16.mxu0 %v135_v22  ;;  %342 = vmatprep.subr.bf16.mxu1 %v135_v22 }
  0x39   :  { %179 = vmatpush1.bf16.msra.mxu0 %v134_v27  ;;  %358 = vmatpush1.bf16.msra.mxu1 %v134_v27 }
  0x3a   :  { %180 = vmatprep.subr.bf16.mxu0 %v137_v28  ;;  %343 = vmatprep.subr.bf16.mxu1 %v137_v28 }
  0x3d   :  { %181 = vmatpush1.bf16.msra.mxu0 %v136_v33  ;;  %359 = vmatpush1.bf16.msra.mxu1 %v136_v33 }
  0x3e   :  { %182 = vmatprep.subr.bf16.mxu0 %v139_v34  ;;  %344 = vmatprep.subr.bf16.mxu1 %v139_v34 }
  0x41   :  { %183 = vmatpush1.bf16.msra.mxu0 %v138_v39  ;;  %360 = vmatpush1.bf16.msra.mxu1 %v138_v39 }
  0x44   :  { %185 = vmatmul.mubr.bf16.vlgmr.msra.gmra.mrb[0].mxu0 %v34_v46  ;;  %215 = vmatmul.mubr.bf16.vlgmr.msra.gmra.mrb[0].mxu1 %v40_v47 }
  0x45   :  { %194 = vmatprep.mubr.bf16.mxu0 %v37_v48  ;;  %224 = vmatprep.mubr.bf16.mxu1 %v43_v49 }
  0x4c   :  { %195 = vmatmul.mubr.bf16.gmra.mrb[4].mxu0 %v36_v56  ;;  %225 = vmatmul.mubr.bf16.gmra.mrb[4].mxu1 %v42_v57 }
  0x4d   :  { %204 = vmatprep.mubr.bf16.mxu0 %v39_v58 }
  0x54   :  { %205 = vmatmul.mubr.bf16.gmra.mrb[8].mxu0 %v38_v61 }
 0x117   :  { %v186_v5 = vpop.f32.mrb[0].mxu0  ;;  %v216_v6 = vpop.f32.mrb[0].mxu1 }
 0x118   :  { %v187_v7 = vadd.f32 %v186_v5, %v145_v3  ;;  %v188_v8 = vpop.f32.mrb[1].mxu0  ;;  %v217_v9 = vadd.f32 %v216_v6, %v145_v3  ;;  %v218_v10 = vpop.f32.mrb[1].mxu1 }
 0x119   :  { %v189_v11 = vadd.f32 %v188_v8, %v149_v4  ;;  %v190_v12 = vpop.f32.mrb[2].mxu0  ;;  %v219_v13 = vadd.f32 %v218_v10, %v149_v4  ;;  %v220_v14 = vpop.f32.mrb[2].mxu1 }
 0x11a   :  { %v191_v15 = vadd.f32 %v190_v12, %v145_v3  ;;  %v192_v16 = vpop.f32.mrb[3].mxu0  ;;  %v221_v17 = vadd.f32 %v220_v14, %v145_v3  ;;  %v222_v18 = vpop.f32.mrb[3].mxu1 }
 0x11b   :  { %v319_v19 = vpack.c.bf16 %v189_v11, %v187_v7  ;;  %v193_v20 = vadd.f32 %v192_v16, %v149_v4  ;;  %v325_v21 = vpack.c.bf16 %v219_v13, %v217_v9  ;;  %v223_v22 = vadd.f32 %v222_v18, %v149_v4 }
 0x11d   :  { %295 = vst [vmem:[%s669_s3] sm:$0xff] %v319_v19  ;;  %v320_v23 = vpack.c.bf16 %v193_v20, %v191_v15  ;;  %301 = vst [vmem:[%s669_s3 + $0x30] sm:$0xff] %v325_v21  ;;  %v326_v24 = vpack.c.bf16 %v223_v22, %v221_v17 }
 0x11f   :  { %296 = vst [vmem:[%s669_s3 + $0x8] sm:$0xff] %v320_v23  ;;  %v196_v25 = vpop.f32.mrb[4].mxu0  ;;  %302 = vst [vmem:[%s669_s3 + $0x38] sm:$0xff] %v326_v24  ;;  %v226_v26 = vpop.f32.mrb[4].mxu1 }
 0x120   :  { %v197_v27 = vadd.f32 %v196_v25, %v145_v3  ;;  %v198_v28 = vpop.f32.mrb[5].mxu0  ;;  %v227_v29 = vadd.f32 %v226_v26, %v145_v3  ;;  %v228_v30 = vpop.f32.mrb[5].mxu1 }
 0x121   :  { %v199_v31 = vadd.f32 %v198_v28, %v149_v4  ;;  %v200_v32 = vpop.f32.mrb[6].mxu0  ;;  %v229_v33 = vadd.f32 %v228_v30, %v149_v4  ;;  %v230_v34 = vpop.f32.mrb[6].mxu1 }
 0x122   :  { %v201_v35 = vadd.f32 %v200_v32, %v145_v3  ;;  %v202_v36 = vpop.f32.mrb[7].mxu0  ;;  %v231_v37 = vadd.f32 %v230_v34, %v145_v3  ;;  %v232_v38 = vpop.f32.mrb[7].mxu1 }
 0x123   :  { %v321_v39 = vpack.c.bf16 %v199_v31, %v197_v27  ;;  %v203_v40 = vadd.f32 %v202_v36, %v149_v4  ;;  %v327_v41 = vpack.c.bf16 %v229_v33, %v227_v29  ;;  %v233_v42 = vadd.f32 %v232_v38, %v149_v4 }
 0x125   :  { %297 = vst [vmem:[%s669_s3 + $0x10] sm:$0xff] %v321_v39  ;;  %v322_v43 = vpack.c.bf16 %v203_v40, %v201_v35  ;;  %303 = vst [vmem:[%s669_s3 + $0x40] sm:$0xff] %v327_v41  ;;  %v328_v44 = vpack.c.bf16 %v233_v42, %v231_v37 }
 0x127   :  { %298 = vst [vmem:[%s669_s3 + $0x18] sm:$0xff] %v322_v43  ;;  %v206_v45 = vpop.f32.mrb[8].mxu0  ;;  %304 = vst [vmem:[%s669_s3 + $0x48] sm:$0xff] %v328_v44 }
 0x128   :  { %v207_v46 = vadd.f32 %v206_v45, %v145_v3  ;;  %v208_v47 = vpop.f32.mrb[9].mxu0 }
 0x129   :  { %v209_v48 = vadd.f32 %v208_v47, %v149_v4  ;;  %v210_v49 = vpop.f32.mrb[10].mxu0 }
 0x12a   :  { %v211_v50 = vadd.f32 %v210_v49, %v145_v3  ;;  %v212_v51 = vpop.f32.mrb[11].mxu0 }
 0x12b   :  { %v323_v52 = vpack.c.bf16 %v209_v48, %v207_v46  ;;  %v213_v53 = vadd.f32 %v212_v51, %v149_v4 }
 0x12d   :  { %299 = vst [vmem:[%s669_s3 + $0x20] sm:$0xff] %v323_v52  ;;  %v324_v54 = vpack.c.bf16 %v213_v53, %v211_v50 }
 0x12f   :  { %300 = vst [vmem:[%s669_s3 + $0x28] sm:$0xff] %v324_v54 }

// kernel: attention_forward.6
= control target key start
LH: loop header
LB: loop body
LE: loop exit
PB: predicated region body
PF: predicated region fallthrough
CT: control target
= control target key end

     0   :  { %8 = vsyncpa [#allocation3], 0  ;;  %s575_s0 = inlined_call_operand.hbm [shape: f32[80,256], index: 0, kind: input, shape index: {}]   ;;  %s576_s1 = inlined_call_operand.hbm [shape: f32[256,256], index: 1, kind: input, shape index: {}]   ;;  %s577_s2 = inlined_call_operand.hbm [shape: f32[1,256], index: 2, kind: input, shape index: {}]   ;;  %s578_s3 = inlined_call_operand.vmem [shape: bf16[80,256], index: 3, kind: output, shape index: {}]  }
   0x1   :  { %9 = vsyncpa [#allocation5], 0  ;;  %s477_s12 = smov [#allocation4]   ;;  %s478_s14 = smov [#allocation2]  }
   0x2   :  { %s27_s13 = sshll.u32 %s477_s12, 4  ;;  %s15_s15 = sshll.u32 %s478_s14, 4  ;;  %s28_s13 = int_to_ptr.vmem [resolvable:$true] %s27_s13  ;;  %s502_s15 = int_to_ptr.vmem [resolvable:$true] %s15_s15 }
   0x3   :  { %s407_s18 = scalar_lea.hbm %s576_s1, 8192 }
   0x4   :  { %p408_p0 = scmp.ne.s32.totalorder %s576_s1, %s407_s18  ;;  %p411_p1 = scmp.lt.u32.totalorder %s407_s18, %s576_s1 }
   0x6   :  { %p413_p2 = pnand %p411_p1, %p408_p0 }
   0x8   :  { %416 = shalt.err (!%p413_p2)
}
   0x9   :  { %s417_s23 = scalar_lea.vmem %s28_s13, 8192  ;;  %p422_p4 = scmp.lt.s32.totalorder %s28_s13, %s28_s13 }
   0xa   :  { %p418_p3 = scmp.ne.s32.totalorder %s28_s13, %s417_s23  ;;  %p423_p5 = scmp.lt.s32.totalorder %s417_s23, %s417_s23 }
   0xc   :  { %p424_p6 = por %p423_p5, %p422_p4 }
   0xe   :  { %p425_p7 = pnand %p424_p6, %p418_p3 }
  0x10   :  { %428 = shalt.err (!%p425_p7)
}
  0x11   :  { %s479_s24 = smov 256   ;;  %s480_s25 = smov 16  }
  0x12   :  { %33 = dma.hbm_to_vmem [thread:$0]  %s576_s1, 8192, %s28_s13, [#allocation5], %s479_s24, %s479_s24, %s480_s25  }
  0x13   :  { %s429_s30 = scalar_lea.hbm %s575_s0, 2560 }
  0x14   :  { %p430_p8 = scmp.ne.s32.totalorder %s575_s0, %s429_s30  ;;  %p433_p9 = scmp.lt.u32.totalorder %s429_s30, %s575_s0 }
  0x16   :  { %p435_p10 = pnand %p433_p9, %p430_p8 }
  0x18   :  { %438 = shalt.err (!%p435_p10)
}
  0x19   :  { %s439_s8 = scalar_lea.vmem %s502_s15, 2560  ;;  %p444_p12 = scmp.lt.s32.totalorder %s502_s15, %s502_s15 }
  0x1a   :  { %p440_p11 = scmp.ne.s32.totalorder %s502_s15, %s439_s8  ;;  %p445_p13 = scmp.lt.s32.totalorder %s439_s8, %s439_s8 }
  0x1c   :  { %p446_p0 = por %p445_p13, %p444_p12 }
  0x1e   :  { %p447_p1 = pnand %p446_p0, %p440_p11 }
  0x20   :  { %450 = shalt.err (!%p447_p1)
}
  0x21   :  { %21 = dma.hbm_to_vmem [thread:$0]  %s575_s0, 2560, %s502_s15, [#allocation3], %s479_s24, %s479_s24, %s480_s25  }
  0x22   :  { %s481_s10 = smov [#allocation6]   ;;  %s451_s14 = scalar_lea.hbm %s577_s2, 32 }
  0x23   :  { %s40_s11 = sshll.u32 %s481_s10, 4  ;;  %p452_p2 = scmp.ne.s32.totalorder %s577_s2, %s451_s14  ;;  %s41_s11 = int_to_ptr.vmem [resolvable:$true] %s40_s11 }
  0x24   :  { %p455_p3 = scmp.lt.u32.totalorder %s451_s14, %s577_s2 }
  0x26   :  { %p457_p4 = pnand %p455_p3, %p452_p2 }
  0x28   :  { %460 = shalt.err (!%p457_p4)
}
  0x29   :  { %s461_s20 = scalar_lea.vmem %s41_s11, 32  ;;  %p466_p6 = scmp.lt.s32.totalorder %s41_s11, %s41_s11 }
  0x2a   :  { %p462_p5 = scmp.ne.s32.totalorder %s41_s11, %s461_s20  ;;  %p467_p7 = scmp.lt.s32.totalorder %s461_s20, %s461_s20 }
  0x2c   :  { %p468_p8 = por %p467_p7, %p466_p6 }
  0x2e   :  { %p469_p9 = pnand %p468_p8, %p462_p5 }
  0x30   :  { %472 = shalt.err (!%p469_p9)
}
  0x31   :  { %43 = dma.hbm_to_vmem [thread:$0]  %s577_s2, 32, %s41_s11, [#allocation5]  }
  0x32   :  { %473 = dma.done.wait [#allocation3], 2560  }
  0x33   :  { %474 = vsyncadd [#allocation3], 4294964736 }
  0x34   :  { %475 = dma.done.wait [#allocation5], 8224  }
  0x35   :  { %476 = vsyncadd [#allocation5], 4294959072  ;;  %v84_v0 = vld [vmem:[#allocation4 + $0x8] sm:$0xff]  ;;  %v86_v1 = vld [vmem:[#allocation4 + $0x18] sm:$0xff] }
  0x36   :  { %v83_v2 = vld [vmem:[#allocation4] sm:$0xff]  ;;  %v148_v3 = vpack.c.bf16 %v86_v1, %v84_v0  ;;  %v85_v4 = vld [vmem:[#allocation4 + $0x10] sm:$0xff]  ;;  %v88_v5 = vld [vmem:[#allocation4 + $0x28] sm:$0xff] }
  0x37   :  { %v90_v6 = vld [vmem:[#allocation4 + $0x38] sm:$0xff]  ;;  %v147_v7 = vpack.c.bf16 %v85_v4, %v83_v2  ;;  %v87_v9 = vld [vmem:[#allocation4 + $0x20] sm:$0xff]  ;;  %v89_v10 = vld [vmem:[#allocation4 + $0x30] sm:$0xff] }
  0x38   :  { %v150_v8 = vpack.c.bf16 %v90_v6, %v88_v5  ;;  %v92_v11 = vld [vmem:[#allocation4 + $0x48] sm:$0xff]  ;;  %191 = vmatprep.subr.bf16.mxu0 %v148_v3  ;;  %370 = vmatprep.subr.bf16.mxu1 %v148_v3  ;;  %v94_v12 = vld [vmem:[#allocation4 + $0x58] sm:$0xff]  ;;  %v149_v13 = vpack.c.bf16 %v89_v10, %v87_v9  ;;  %v91_v15 = vld [vmem:[#allocation4 + $0x40] sm:$0xff] }
  0x39   :  { %192 = vmatpush1.bf16.msra.mxu0 %v147_v7  ;;  %386 = vmatpush1.bf16.msra.mxu1 %v147_v7  ;;  %v152_v14 = vpack.c.bf16 %v94_v12, %v92_v11  ;;  %v93_v16 = vld [vmem:[#allocation4 + $0x50] sm:$0xff]  ;;  %v96_v17 = vld [vmem:[#allocation4 + $0x68] sm:$0xff]  ;;  %v98_v18 = vld [vmem:[#allocation4 + $0x78] sm:$0xff] }
  0x3a   :  { %193 = vmatprep.subr.bf16.mxu0 %v150_v8  ;;  %371 = vmatprep.subr.bf16.mxu1 %v150_v8  ;;  %v151_v19 = vpack.c.bf16 %v93_v16, %v91_v15  ;;  %v154_v20 = vpack.c.bf16 %v98_v18, %v96_v17  ;;  %v95_v21 = vld [vmem:[#allocation4 + $0x60] sm:$0xff]  ;;  %v97_v22 = vld [vmem:[#allocation4 + $0x70] sm:$0xff]  ;;  %v100_v23 = vld [vmem:[#allocation4 + $0x88] sm:$0xff] }
  0x3b   :  { %v102_v24 = vld [vmem:[#allocation4 + $0x98] sm:$0xff]  ;;  %v153_v25 = vpack.c.bf16 %v97_v22, %v95_v21  ;;  %v99_v27 = vld [vmem:[#allocation4 + $0x80] sm:$0xff]  ;;  %v101_v28 = vld [vmem:[#allocation4 + $0x90] sm:$0xff] }
  0x3c   :  { %v156_v26 = vpack.c.bf16 %v102_v24, %v100_v23  ;;  %v104_v29 = vld [vmem:[#allocation4 + $0xa8] sm:$0xff]  ;;  %v106_v30 = vld [vmem:[#allocation4 + $0xb8] sm:$0xff]  ;;  %v155_v31 = vpack.c.bf16 %v101_v28, %v99_v27  ;;  %v103_v33 = vld [vmem:[#allocation4 + $0xa0] sm:$0xff] }
  0x3d   :  { %194 = vmatpush1.bf16.msra.mxu0 %v149_v13  ;;  %387 = vmatpush1.bf16.msra.mxu1 %v149_v13  ;;  %v158_v32 = vpack.c.bf16 %v106_v30, %v104_v29  ;;  %v105_v34 = vld [vmem:[#allocation4 + $0xb0] sm:$0xff]  ;;  %v108_v35 = vld [vmem:[#allocation4 + $0xc8] sm:$0xff]  ;;  %v110_v36 = vld [vmem:[#allocation4 + $0xd8] sm:$0xff] }
  0x3e   :  { %195 = vmatprep.subr.bf16.mxu0 %v152_v14  ;;  %372 = vmatprep.subr.bf16.mxu1 %v152_v14  ;;  %v157_v37 = vpack.c.bf16 %v105_v34, %v103_v33  ;;  %v107_v38 = vld [vmem:[#allocation4 + $0xc0] sm:$0xff]  ;;  %v160_v39 = vpack.c.bf16 %v110_v36, %v108_v35  ;;  %v109_v40 = vld [vmem:[#allocation4 + $0xd0] sm:$0xff]  ;;  %v54_v41 = vld [vmem:[#allocation2 + $0x8] sm:$0xff] }
  0x3f   :  { %v56_v42 = vld [vmem:[#allocation2 + $0x18] sm:$0xff]  ;;  %v112_v43 = vld [vmem:[#allocation4 + $0xe8] sm:$0xff]  ;;  %v159_v48 = vpack.c.bf16 %v109_v40, %v107_v38  ;;  %v111_v51 = vld [vmem:[#allocation4 + $0xe0] sm:$0xff] }
  0x40   :  { %v114_v44 = vld [vmem:[#allocation4 + $0xf8] sm:$0xff]  ;;  %v74_v45 = vpack.c.bf16 %v56_v42, %v54_v41  ;;  %v66_v46 = vld [vmem:[#allocation2 + $0x68] sm:$0xff]  ;;  %v113_v52 = vld [vmem:[#allocation4 + $0xf0] sm:$0xff] }
  0x41   :  { %196 = vmatpush1.bf16.msra.mxu0 %v151_v19  ;;  %388 = vmatpush1.bf16.msra.mxu1 %v151_v19  ;;  %v68_v47 = vld [vmem:[#allocation2 + $0x78] sm:$0xff]  ;;  %v162_v50 = vpack.c.bf16 %v114_v44, %v112_v43  ;;  %v116_v53 = vld [vmem:[#allocation4 + $0x108] sm:$0xff]  ;;  %v161_v55 = vpack.c.bf16 %v113_v52, %v111_v51  ;;  %v115_v57 = vld [vmem:[#allocation4 + $0x100] sm:$0xff] }
  0x42   :  { %197 = vmatprep.subr.bf16.mxu0 %v154_v20  ;;  %373 = vmatprep.subr.bf16.mxu1 %v154_v20  ;;  %v80_v49 = vpack.c.bf16 %v68_v47, %v66_v46  ;;  %v118_v54 = vld [vmem:[#allocation4 + $0x118] sm:$0xff]  ;;  %v117_v58 = vld [vmem:[#allocation4 + $0x110] sm:$0xff]  ;;  %v120_v59 = vld [vmem:[#allocation4 + $0x128] sm:$0xff] }
  0x43   :  { %223 = vmatprep.mubr.bf16.mxu0 %v74_v45  ;;  %v164_v56 = vpack.c.bf16 %v118_v54, %v116_v53  ;;  %v122_v60 = vld [vmem:[#allocation4 + $0x138] sm:$0xff]  ;;  %v163_v61 = vpack.c.bf16 %v117_v58, %v115_v57  ;;  %v119_v63 = vld [vmem:[#allocation4 + $0x120] sm:$0xff]  ;;  %v121_v0 = vld [vmem:[#allocation4 + $0x130] sm:$0xff] }
  0x44   :  { %253 = vmatprep.mubr.bf16.mxu1 %v80_v49  ;;  %v166_v62 = vpack.c.bf16 %v122_v60, %v120_v59  ;;  %v124_v1 = vld [vmem:[#allocation4 + $0x148] sm:$0xff]  ;;  %v126_v2 = vld [vmem:[#allocation4 + $0x158] sm:$0xff]  ;;  %v165_v3 = vpack.c.bf16 %v121_v0, %v119_v63  ;;  %v123_v5 = vld [vmem:[#allocation4 + $0x140] sm:$0xff] }
  0x45   :  { %198 = vmatpush1.bf16.msra.mxu0 %v153_v25  ;;  %389 = vmatpush1.bf16.msra.mxu1 %v153_v25  ;;  %v168_v4 = vpack.c.bf16 %v126_v2, %v124_v1  ;;  %v125_v6 = vld [vmem:[#allocation4 + $0x150] sm:$0xff]  ;;  %v128_v7 = vld [vmem:[#allocation4 + $0x168] sm:$0xff]  ;;  %v130_v8 = vld [vmem:[#allocation4 + $0x178] sm:$0xff] }
  0x46   :  { %199 = vmatprep.subr.bf16.mxu0 %v156_v26  ;;  %374 = vmatprep.subr.bf16.mxu1 %v156_v26  ;;  %v167_v9 = vpack.c.bf16 %v125_v6, %v123_v5  ;;  %v170_v10 = vpack.c.bf16 %v130_v8, %v128_v7  ;;  %v127_v11 = vld [vmem:[#allocation4 + $0x160] sm:$0xff]  ;;  %v129_v12 = vld [vmem:[#allocation4 + $0x170] sm:$0xff]  ;;  %v132_v13 = vld [vmem:[#allocation4 + $0x188] sm:$0xff] }
  0x47   :  { %v134_v14 = vld [vmem:[#allocation4 + $0x198] sm:$0xff]  ;;  %v169_v15 = vpack.c.bf16 %v129_v12, %v127_v11  ;;  %v131_v17 = vld [vmem:[#allocation4 + $0x180] sm:$0xff]  ;;  %v133_v18 = vld [vmem:[#allocation4 + $0x190] sm:$0xff] }
  0x48   :  { %v172_v16 = vpack.c.bf16 %v134_v14, %v132_v13  ;;  %v136_v19 = vld [vmem:[#allocation4 + $0x1a8] sm:$0xff]  ;;  %v138_v20 = vld [vmem:[#allocation4 + $0x1b8] sm:$0xff]  ;;  %v171_v21 = vpack.c.bf16 %v133_v18, %v131_v17  ;;  %v135_v23 = vld [vmem:[#allocation4 + $0x1a0] sm:$0xff] }
  0x49   :  { %200 = vmatpush1.bf16.msra.mxu0 %v155_v31  ;;  %390 = vmatpush1.bf16.msra.mxu1 %v155_v31  ;;  %v174_v22 = vpack.c.bf16 %v138_v20, %v136_v19  ;;  %v137_v24 = vld [vmem:[#allocation4 + $0x1b0] sm:$0xff]  ;;  %v140_v25 = vld [vmem:[#allocation4 + $0x1c8] sm:$0xff]  ;;  %v142_v26 = vld [vmem:[#allocation4 + $0x1d8] sm:$0xff] }
  0x4a   :  { %201 = vmatprep.subr.bf16.mxu0 %v158_v32  ;;  %375 = vmatprep.subr.bf16.mxu1 %v158_v32  ;;  %v173_v27 = vpack.c.bf16 %v137_v24, %v135_v23  ;;  %v176_v28 = vpack.c.bf16 %v142_v26, %v140_v25  ;;  %v139_v29 = vld [vmem:[#allocation4 + $0x1c0] sm:$0xff]  ;;  %v141_v30 = vld [vmem:[#allocation4 + $0x1d0] sm:$0xff]  ;;  %v144_v31 = vld [vmem:[#allocation4 + $0x1e8] sm:$0xff] }
  0x4b   :  { %v146_v32 = vld [vmem:[#allocation4 + $0x1f8] sm:$0xff]  ;;  %v175_v33 = vpack.c.bf16 %v141_v30, %v139_v29  ;;  %v143_v35 = vld [vmem:[#allocation4 + $0x1e0] sm:$0xff]  ;;  %v145_v36 = vld [vmem:[#allocation4 + $0x1f0] sm:$0xff] }
  0x4c   :  { %v178_v34 = vpack.c.bf16 %v146_v32, %v144_v31  ;;  %v55_v38 = vld [vmem:[#allocation2 + $0x10] sm:$0xff]  ;;  %v65_v40 = vld [vmem:[#allocation2 + $0x60] sm:$0xff]  ;;  %v58_v42 = vld [vmem:[#allocation2 + $0x28] sm:$0xff] }
  0x4d   :  { %202 = vmatpush1.bf16.msra.mxu0 %v157_v37  ;;  %391 = vmatpush1.bf16.msra.mxu1 %v157_v37  ;;  %v53_v37 = vld [vmem:[#allocation2] sm:$0xff]  ;;  %v67_v41 = vld [vmem:[#allocation2 + $0x70] sm:$0xff]  ;;  %v60_v43 = vld [vmem:[#allocation2 + $0x38] sm:$0xff] }
  0x4e   :  { %203 = vmatprep.subr.bf16.mxu0 %v160_v39  ;;  %376 = vmatprep.subr.bf16.mxu1 %v160_v39  ;;  %v177_v39 = vpack.c.bf16 %v145_v36, %v143_v35  ;;  %v70_v44 = vld [vmem:[#allocation2 + $0x88] sm:$0xff]  ;;  %v72_v45 = vld [vmem:[#allocation2 + $0x98] sm:$0xff]  ;;  %v73_v46 = vpack.c.bf16 %v55_v38, %v53_v37  ;;  %v79_v47 = vpack.c.bf16 %v67_v41, %v65_v40  ;;  %v59_v51 = vld [vmem:[#allocation2 + $0x30] sm:$0xff] }
  0x4f   :  { %v82_v49 = vpack.c.bf16 %v72_v45, %v70_v44  ;;  %v69_v52 = vld [vmem:[#allocation2 + $0x80] sm:$0xff]  ;;  %v71_v53 = vld [vmem:[#allocation2 + $0x90] sm:$0xff]  ;;  %v62_v54 = vld [vmem:[#allocation2 + $0x48] sm:$0xff] }
  0x50   :  { %v81_v57 = vpack.c.bf16 %v71_v53, %v69_v52  ;;  %v61_v59 = vld [vmem:[#allocation2 + $0x40] sm:$0xff]  ;;  %v63_v60 = vld [vmem:[#allocation2 + $0x50] sm:$0xff] }
  0x51   :  { %204 = vmatpush1.bf16.msra.mxu0 %v159_v48  ;;  %392 = vmatpush1.bf16.msra.mxu1 %v159_v48  ;;  %v76_v48 = vpack.c.bf16 %v60_v43, %v58_v42  ;;  %v179_v1 = vld [vmem:[#allocation6] sm:$0x3] }
  0x52   :  { %205 = vmatprep.subr.bf16.mxu0 %v162_v50  ;;  %377 = vmatprep.subr.bf16.mxu1 %v162_v50  ;;  %v57_v50 = vld [vmem:[#allocation2 + $0x20] sm:$0xff] }
  0x55   :  { %206 = vmatpush1.bf16.msra.mxu0 %v161_v55  ;;  %393 = vmatpush1.bf16.msra.mxu1 %v161_v55  ;;  %v64_v55 = vld [vmem:[#allocation2 + $0x58] sm:$0xff] }
  0x56   :  { %207 = vmatprep.subr.bf16.mxu0 %v164_v56  ;;  %378 = vmatprep.subr.bf16.mxu1 %v164_v56  ;;  %v75_v56 = vpack.c.bf16 %v59_v51, %v57_v50  ;;  %v78_v58 = vpack.c.bf16 %v64_v55, %v62_v54 }
  0x59   :  { %208 = vmatpush1.bf16.msra.mxu0 %v163_v61  ;;  %394 = vmatpush1.bf16.msra.mxu1 %v163_v61  ;;  %v77_v61 = vpack.c.bf16 %v63_v60, %v61_v59 }
  0x5a   :  { %209 = vmatprep.subr.bf16.mxu0 %v166_v62  ;;  %379 = vmatprep.subr.bf16.mxu1 %v166_v62  ;;  %v181_v62 = vlaneseq }
  0x5c   :  { %v182_v63 = vshrl.u32 %v181_v62, 7 }
  0x5d   :  { %210 = vmatpush1.bf16.msra.mxu0 %v165_v3  ;;  %395 = vmatpush1.bf16.msra.mxu1 %v165_v3 }
  0x5e   :  { %211 = vmatprep.subr.bf16.mxu0 %v168_v4  ;;  %380 = vmatprep.subr.bf16.mxu1 %v168_v4  ;;  %v183_v0 = vsub.s32 0, %v182_v63  ;;  %v187_v2 = vsub.s32 1, %v182_v63 }
  0x60   :  { %v184_v3 = vrot.slane %v179_v1, %v183_v0  ;;  %v188_v4 = vrot.slane %v179_v1, %v187_v2 }
  0x61   :  { %212 = vmatpush1.bf16.msra.mxu0 %v167_v9  ;;  %396 = vmatpush1.bf16.msra.mxu1 %v167_v9 }
  0x62   :  { %213 = vmatprep.subr.bf16.mxu0 %v170_v10  ;;  %381 = vmatprep.subr.bf16.mxu1 %v170_v10 }
  0x65   :  { %214 = vmatpush1.bf16.msra.mxu0 %v169_v15  ;;  %397 = vmatpush1.bf16.msra.mxu1 %v169_v15 }
  0x66   :  { %215 = vmatprep.subr.bf16.mxu0 %v172_v16  ;;  %382 = vmatprep.subr.bf16.mxu1 %v172_v16 }
  0x69   :  { %216 = vmatpush1.bf16.msra.mxu0 %v171_v21  ;;  %398 = vmatpush1.bf16.msra.mxu1 %v171_v21 }
  0x6a   :  { %217 = vmatprep.subr.bf16.mxu0 %v174_v22  ;;  %383 = vmatprep.subr.bf16.mxu1 %v174_v22 }
  0x6d   :  { %218 = vmatpush1.bf16.msra.mxu0 %v173_v27  ;;  %399 = vmatpush1.bf16.msra.mxu1 %v173_v27 }
  0x6e   :  { %219 = vmatprep.subr.bf16.mxu0 %v176_v28  ;;  %384 = vmatprep.subr.bf16.mxu1 %v176_v28 }
  0x71   :  { %220 = vmatpush1.bf16.msra.mxu0 %v175_v33  ;;  %400 = vmatpush1.bf16.msra.mxu1 %v175_v33 }
  0x72   :  { %221 = vmatprep.subr.bf16.mxu0 %v178_v34  ;;  %385 = vmatprep.subr.bf16.mxu1 %v178_v34 }
  0x75   :  { %222 = vmatpush1.bf16.msra.mxu0 %v177_v39  ;;  %401 = vmatpush1.bf16.msra.mxu1 %v177_v39 }
  0x78   :  { %224 = vmatmul.mubr.bf16.vlgmr.msra.gmra.mrb[0].mxu0 %v73_v46  ;;  %254 = vmatmul.mubr.bf16.vlgmr.msra.gmra.mrb[0].mxu1 %v79_v47 }
  0x79   :  { %233 = vmatprep.mubr.bf16.mxu0 %v76_v48  ;;  %263 = vmatprep.mubr.bf16.mxu1 %v82_v49 }
  0x80   :  { %234 = vmatmul.mubr.bf16.gmra.mrb[4].mxu0 %v75_v56  ;;  %264 = vmatmul.mubr.bf16.gmra.mrb[4].mxu1 %v81_v57 }
  0x81   :  { %243 = vmatprep.mubr.bf16.mxu0 %v78_v58 }
  0x88   :  { %244 = vmatmul.mubr.bf16.gmra.mrb[8].mxu0 %v77_v61 }
 0x14b   :  { %v225_v5 = vpop.f32.mrb[0].mxu0  ;;  %v255_v6 = vpop.f32.mrb[0].mxu1 }
 0x14c   :  { %v226_v7 = vadd.f32 %v225_v5, %v184_v3  ;;  %v227_v8 = vpop.f32.mrb[1].mxu0  ;;  %v256_v9 = vadd.f32 %v255_v6, %v184_v3  ;;  %v257_v10 = vpop.f32.mrb[1].mxu1 }
 0x14d   :  { %v228_v11 = vadd.f32 %v227_v8, %v188_v4  ;;  %v229_v12 = vpop.f32.mrb[2].mxu0  ;;  %v258_v13 = vadd.f32 %v257_v10, %v188_v4  ;;  %v259_v14 = vpop.f32.mrb[2].mxu1 }
 0x14e   :  { %v230_v15 = vadd.f32 %v229_v12, %v184_v3  ;;  %v231_v16 = vpop.f32.mrb[3].mxu0  ;;  %v260_v17 = vadd.f32 %v259_v14, %v184_v3  ;;  %v261_v18 = vpop.f32.mrb[3].mxu1 }
 0x14f   :  { %v360_v19 = vpack.c.bf16 %v228_v11, %v226_v7  ;;  %v232_v20 = vadd.f32 %v231_v16, %v188_v4  ;;  %v366_v21 = vpack.c.bf16 %v258_v13, %v256_v9  ;;  %v262_v22 = vadd.f32 %v261_v18, %v188_v4 }
 0x151   :  { %334 = vst [vmem:[%s578_s3] sm:$0xff] %v360_v19  ;;  %v361_v23 = vpack.c.bf16 %v232_v20, %v230_v15  ;;  %340 = vst [vmem:[%s578_s3 + $0x30] sm:$0xff] %v366_v21  ;;  %v367_v24 = vpack.c.bf16 %v262_v22, %v260_v17 }
 0x153   :  { %335 = vst [vmem:[%s578_s3 + $0x8] sm:$0xff] %v361_v23  ;;  %v235_v25 = vpop.f32.mrb[4].mxu0  ;;  %341 = vst [vmem:[%s578_s3 + $0x38] sm:$0xff] %v367_v24  ;;  %v265_v26 = vpop.f32.mrb[4].mxu1 }
 0x154   :  { %v236_v27 = vadd.f32 %v235_v25, %v184_v3  ;;  %v237_v28 = vpop.f32.mrb[5].mxu0  ;;  %v266_v29 = vadd.f32 %v265_v26, %v184_v3  ;;  %v267_v30 = vpop.f32.mrb[5].mxu1 }
 0x155   :  { %v238_v31 = vadd.f32 %v237_v28, %v188_v4  ;;  %v239_v32 = vpop.f32.mrb[6].mxu0  ;;  %v268_v33 = vadd.f32 %v267_v30, %v188_v4  ;;  %v269_v34 = vpop.f32.mrb[6].mxu1 }
 0x156   :  { %v240_v35 = vadd.f32 %v239_v32, %v184_v3  ;;  %v241_v36 = vpop.f32.mrb[7].mxu0  ;;  %v270_v37 = vadd.f32 %v269_v34, %v184_v3  ;;  %v271_v38 = vpop.f32.mrb[7].mxu1 }
 0x157   :  { %v362_v39 = vpack.c.bf16 %v238_v31, %v236_v27  ;;  %v242_v40 = vadd.f32 %v241_v36, %v188_v4  ;;  %v368_v41 = vpack.c.bf16 %v268_v33, %v266_v29  ;;  %v272_v42 = vadd.f32 %v271_v38, %v188_v4 }
 0x159   :  { %336 = vst [vmem:[%s578_s3 + $0x10] sm:$0xff] %v362_v39  ;;  %v363_v43 = vpack.c.bf16 %v242_v40, %v240_v35  ;;  %342 = vst [vmem:[%s578_s3 + $0x40] sm:$0xff] %v368_v41  ;;  %v369_v44 = vpack.c.bf16 %v272_v42, %v270_v37 }
 0x15b   :  { %337 = vst [vmem:[%s578_s3 + $0x18] sm:$0xff] %v363_v43  ;;  %v245_v45 = vpop.f32.mrb[8].mxu0  ;;  %343 = vst [vmem:[%s578_s3 + $0x48] sm:$0xff] %v369_v44 }
 0x15c   :  { %v246_v46 = vadd.f32 %v245_v45, %v184_v3  ;;  %v247_v47 = vpop.f32.mrb[9].mxu0 }
 0x15d   :  { %v248_v48 = vadd.f32 %v247_v47, %v188_v4  ;;  %v249_v49 = vpop.f32.mrb[10].mxu0 }
 0x15e   :  { %v250_v50 = vadd.f32 %v249_v49, %v184_v3  ;;  %v251_v51 = vpop.f32.mrb[11].mxu0 }
 0x15f   :  { %v364_v52 = vpack.c.bf16 %v248_v48, %v246_v46  ;;  %v252_v53 = vadd.f32 %v251_v51, %v188_v4 }
 0x161   :  { %338 = vst [vmem:[%s578_s3 + $0x20] sm:$0xff] %v364_v52  ;;  %v365_v54 = vpack.c.bf16 %v252_v53, %v250_v50 }
 0x163   :  { %339 = vst [vmem:[%s578_s3 + $0x28] sm:$0xff] %v365_v54 }
 0x164   :  { %348 = vsyncpa [#allocation3], 1 }
 0x165   :  { %349 = vsyncpa [#allocation5], 1 }

// kernel: attention_forward.5
= control target key start
LH: loop header
LB: loop body
LE: loop exit
PB: predicated region body
PF: predicated region fallthrough
CT: control target
= control target key end

     0   :  { %s542_s1 = inlined_call_operand.vmem [shape: f32[256,256], index: 1, kind: input, shape index: {}]   ;;  %s543_s0 = inlined_call_operand.vmem [shape: f32[40,256], index: 0, kind: input, shape index: {}]   ;;  %s544_s2 = inlined_call_operand.vmem [shape: f32[1,256], index: 2, kind: input, shape index: {}]   ;;  %s545_s3 = inlined_call_operand.vmem [shape: bf16[40,256], index: 3, kind: output, shape index: {}]  }
   0x1   :  { %v31_v0 = vld [vmem:[%s542_s1 + $0x8] sm:$0xff]  ;;  %v33_v1 = vld [vmem:[%s542_s1 + $0x18] sm:$0xff]  ;;  %v30_v2 = vld [vmem:[%s542_s1] sm:$0xff] }
   0x2   :  { %v95_v3 = vpack.c.bf16 %v33_v1, %v31_v0  ;;  %v32_v4 = vld [vmem:[%s542_s1 + $0x10] sm:$0xff]  ;;  %v35_v5 = vld [vmem:[%s542_s1 + $0x28] sm:$0xff]  ;;  %v37_v6 = vld [vmem:[%s542_s1 + $0x38] sm:$0xff] }
   0x3   :  { %v94_v7 = vpack.c.bf16 %v32_v4, %v30_v2  ;;  %v97_v8 = vpack.c.bf16 %v37_v6, %v35_v5  ;;  %v34_v9 = vld [vmem:[%s542_s1 + $0x20] sm:$0xff]  ;;  %v36_v10 = vld [vmem:[%s542_s1 + $0x30] sm:$0xff]  ;;  %v39_v11 = vld [vmem:[%s542_s1 + $0x48] sm:$0xff] }
   0x4   :  { %250 = vmatprep.subr.bf16.mxu1 %v95_v3  ;;  %138 = vmatprep.subr.bf16.mxu0 %v95_v3  ;;  %v41_v12 = vld [vmem:[%s542_s1 + $0x58] sm:$0xff]  ;;  %v96_v13 = vpack.c.bf16 %v36_v10, %v34_v9  ;;  %v38_v15 = vld [vmem:[%s542_s1 + $0x40] sm:$0xff]  ;;  %v40_v16 = vld [vmem:[%s542_s1 + $0x50] sm:$0xff] }
   0x5   :  { %266 = vmatpush1.bf16.msra.mxu1 %v94_v7  ;;  %139 = vmatpush1.bf16.msra.mxu0 %v94_v7  ;;  %v99_v14 = vpack.c.bf16 %v41_v12, %v39_v11  ;;  %v43_v17 = vld [vmem:[%s542_s1 + $0x68] sm:$0xff]  ;;  %v45_v18 = vld [vmem:[%s542_s1 + $0x78] sm:$0xff]  ;;  %v98_v19 = vpack.c.bf16 %v40_v16, %v38_v15  ;;  %v42_v21 = vld [vmem:[%s542_s1 + $0x60] sm:$0xff] }
   0x6   :  { %251 = vmatprep.subr.bf16.mxu1 %v97_v8  ;;  %140 = vmatprep.subr.bf16.mxu0 %v97_v8  ;;  %v101_v20 = vpack.c.bf16 %v45_v18, %v43_v17  ;;  %v44_v22 = vld [vmem:[%s542_s1 + $0x70] sm:$0xff]  ;;  %v47_v23 = vld [vmem:[%s542_s1 + $0x88] sm:$0xff]  ;;  %v49_v24 = vld [vmem:[%s542_s1 + $0x98] sm:$0xff] }
   0x7   :  { %v100_v25 = vpack.c.bf16 %v44_v22, %v42_v21  ;;  %v103_v26 = vpack.c.bf16 %v49_v24, %v47_v23  ;;  %v46_v27 = vld [vmem:[%s542_s1 + $0x80] sm:$0xff]  ;;  %v48_v28 = vld [vmem:[%s542_s1 + $0x90] sm:$0xff]  ;;  %v51_v29 = vld [vmem:[%s542_s1 + $0xa8] sm:$0xff] }
   0x8   :  { %v53_v30 = vld [vmem:[%s542_s1 + $0xb8] sm:$0xff]  ;;  %v102_v31 = vpack.c.bf16 %v48_v28, %v46_v27  ;;  %v50_v33 = vld [vmem:[%s542_s1 + $0xa0] sm:$0xff]  ;;  %v52_v34 = vld [vmem:[%s542_s1 + $0xb0] sm:$0xff] }
   0x9   :  { %267 = vmatpush1.bf16.msra.mxu1 %v96_v13  ;;  %141 = vmatpush1.bf16.msra.mxu0 %v96_v13  ;;  %v105_v32 = vpack.c.bf16 %v53_v30, %v51_v29  ;;  %v55_v35 = vld [vmem:[%s542_s1 + $0xc8] sm:$0xff]  ;;  %v57_v36 = vld [vmem:[%s542_s1 + $0xd8] sm:$0xff]  ;;  %v104_v37 = vpack.c.bf16 %v52_v34, %v50_v33  ;;  %v54_v38 = vld [vmem:[%s542_s1 + $0xc0] sm:$0xff] }
   0xa   :  { %252 = vmatprep.subr.bf16.mxu1 %v99_v14  ;;  %142 = vmatprep.subr.bf16.mxu0 %v99_v14  ;;  %v107_v39 = vpack.c.bf16 %v57_v36, %v55_v35  ;;  %v56_v40 = vld [vmem:[%s542_s1 + $0xd0] sm:$0xff]  ;;  %v19_v41 = vld [vmem:[%s543_s0 + $0x28] sm:$0xff]  ;;  %v21_v42 = vld [vmem:[%s543_s0 + $0x38] sm:$0xff] }
   0xb   :  { %v59_v43 = vld [vmem:[%s542_s1 + $0xe8] sm:$0xff]  ;;  %v61_v44 = vld [vmem:[%s542_s1 + $0xf8] sm:$0xff]  ;;  %v27_v45 = vpack.c.bf16 %v21_v42, %v19_v41  ;;  %v106_v48 = vpack.c.bf16 %v56_v40, %v54_v38  ;;  %v58_v51 = vld [vmem:[%s542_s1 + $0xe0] sm:$0xff] }
   0xc   :  { %v15_v46 = vld [vmem:[%s543_s0 + $0x8] sm:$0xff]  ;;  %v17_v47 = vld [vmem:[%s543_s0 + $0x18] sm:$0xff]  ;;  %v109_v50 = vpack.c.bf16 %v61_v44, %v59_v43  ;;  %v60_v52 = vld [vmem:[%s542_s1 + $0xf0] sm:$0xff] }
   0xd   :  { %268 = vmatpush1.bf16.msra.mxu1 %v98_v19  ;;  %143 = vmatpush1.bf16.msra.mxu0 %v98_v19  ;;  %v25_v49 = vpack.c.bf16 %v17_v47, %v15_v46  ;;  %v63_v53 = vld [vmem:[%s542_s1 + $0x108] sm:$0xff]  ;;  %v65_v54 = vld [vmem:[%s542_s1 + $0x118] sm:$0xff]  ;;  %v108_v55 = vpack.c.bf16 %v60_v52, %v58_v51  ;;  %v62_v57 = vld [vmem:[%s542_s1 + $0x100] sm:$0xff] }
   0xe   :  { %253 = vmatprep.subr.bf16.mxu1 %v101_v20  ;;  %144 = vmatprep.subr.bf16.mxu0 %v101_v20  ;;  %v111_v56 = vpack.c.bf16 %v65_v54, %v63_v53  ;;  %v64_v58 = vld [vmem:[%s542_s1 + $0x110] sm:$0xff]  ;;  %v67_v59 = vld [vmem:[%s542_s1 + $0x128] sm:$0xff]  ;;  %v69_v60 = vld [vmem:[%s542_s1 + $0x138] sm:$0xff] }
   0xf   :  { %180 = vmatprep.mubr.bf16.mxu1 %v27_v45  ;;  %170 = vmatprep.mubr.bf16.mxu0 %v25_v49  ;;  %v110_v61 = vpack.c.bf16 %v64_v58, %v62_v57  ;;  %v113_v62 = vpack.c.bf16 %v69_v60, %v67_v59  ;;  %v66_v63 = vld [vmem:[%s542_s1 + $0x120] sm:$0xff]  ;;  %v68_v0 = vld [vmem:[%s542_s1 + $0x130] sm:$0xff]  ;;  %v71_v1 = vld [vmem:[%s542_s1 + $0x148] sm:$0xff] }
  0x10   :  { %v73_v2 = vld [vmem:[%s542_s1 + $0x158] sm:$0xff]  ;;  %v112_v3 = vpack.c.bf16 %v68_v0, %v66_v63  ;;  %v70_v5 = vld [vmem:[%s542_s1 + $0x140] sm:$0xff]  ;;  %v72_v6 = vld [vmem:[%s542_s1 + $0x150] sm:$0xff] }
  0x11   :  { %269 = vmatpush1.bf16.msra.mxu1 %v100_v25  ;;  %145 = vmatpush1.bf16.msra.mxu0 %v100_v25  ;;  %v115_v4 = vpack.c.bf16 %v73_v2, %v71_v1  ;;  %v75_v7 = vld [vmem:[%s542_s1 + $0x168] sm:$0xff]  ;;  %v77_v8 = vld [vmem:[%s542_s1 + $0x178] sm:$0xff]  ;;  %v114_v9 = vpack.c.bf16 %v72_v6, %v70_v5  ;;  %v74_v11 = vld [vmem:[%s542_s1 + $0x160] sm:$0xff] }
  0x12   :  { %254 = vmatprep.subr.bf16.mxu1 %v103_v26  ;;  %146 = vmatprep.subr.bf16.mxu0 %v103_v26  ;;  %v117_v10 = vpack.c.bf16 %v77_v8, %v75_v7  ;;  %v76_v12 = vld [vmem:[%s542_s1 + $0x170] sm:$0xff]  ;;  %v79_v13 = vld [vmem:[%s542_s1 + $0x188] sm:$0xff]  ;;  %v81_v14 = vld [vmem:[%s542_s1 + $0x198] sm:$0xff] }
  0x13   :  { %v116_v15 = vpack.c.bf16 %v76_v12, %v74_v11  ;;  %v119_v16 = vpack.c.bf16 %v81_v14, %v79_v13  ;;  %v78_v17 = vld [vmem:[%s542_s1 + $0x180] sm:$0xff]  ;;  %v80_v18 = vld [vmem:[%s542_s1 + $0x190] sm:$0xff]  ;;  %v83_v19 = vld [vmem:[%s542_s1 + $0x1a8] sm:$0xff] }
  0x14   :  { %v85_v20 = vld [vmem:[%s542_s1 + $0x1b8] sm:$0xff]  ;;  %v118_v21 = vpack.c.bf16 %v80_v18, %v78_v17  ;;  %v82_v23 = vld [vmem:[%s542_s1 + $0x1a0] sm:$0xff]  ;;  %v84_v24 = vld [vmem:[%s542_s1 + $0x1b0] sm:$0xff] }
  0x15   :  { %270 = vmatpush1.bf16.msra.mxu1 %v102_v31  ;;  %147 = vmatpush1.bf16.msra.mxu0 %v102_v31  ;;  %v121_v22 = vpack.c.bf16 %v85_v20, %v83_v19  ;;  %v87_v25 = vld [vmem:[%s542_s1 + $0x1c8] sm:$0xff]  ;;  %v89_v26 = vld [vmem:[%s542_s1 + $0x1d8] sm:$0xff]  ;;  %v120_v27 = vpack.c.bf16 %v84_v24, %v82_v23  ;;  %v86_v29 = vld [vmem:[%s542_s1 + $0x1c0] sm:$0xff] }
  0x16   :  { %255 = vmatprep.subr.bf16.mxu1 %v105_v32  ;;  %148 = vmatprep.subr.bf16.mxu0 %v105_v32  ;;  %v123_v28 = vpack.c.bf16 %v89_v26, %v87_v25  ;;  %v88_v30 = vld [vmem:[%s542_s1 + $0x1d0] sm:$0xff]  ;;  %v91_v31 = vld [vmem:[%s542_s1 + $0x1e8] sm:$0xff]  ;;  %v93_v32 = vld [vmem:[%s542_s1 + $0x1f8] sm:$0xff] }
  0x17   :  { %v122_v33 = vpack.c.bf16 %v88_v30, %v86_v29  ;;  %v125_v34 = vpack.c.bf16 %v93_v32, %v91_v31  ;;  %v90_v35 = vld [vmem:[%s542_s1 + $0x1e0] sm:$0xff]  ;;  %v92_v36 = vld [vmem:[%s542_s1 + $0x1f0] sm:$0xff]  ;;  %v23_v42 = vld [vmem:[%s543_s0 + $0x48] sm:$0xff] }
  0x18   :  { %v124_v38 = vpack.c.bf16 %v92_v36, %v90_v35  ;;  %v14_v40 = vld [vmem:[%s543_s0] sm:$0xff]  ;;  %v16_v41 = vld [vmem:[%s543_s0 + $0x10] sm:$0xff]  ;;  %v29_v45 = vpack.c.bf16 %v23_v42, %v23_v42 }
  0x19   :  { %271 = vmatpush1.bf16.msra.mxu1 %v104_v37  ;;  %149 = vmatpush1.bf16.msra.mxu0 %v104_v37  ;;  %v18_v37 = vld [vmem:[%s543_s0 + $0x20] sm:$0xff]  ;;  %v24_v44 = vpack.c.bf16 %v16_v41, %v14_v40 }
  0x1a   :  { %256 = vmatprep.subr.bf16.mxu1 %v107_v39  ;;  %150 = vmatprep.subr.bf16.mxu0 %v107_v39  ;;  %v20_v39 = vld [vmem:[%s543_s0 + $0x30] sm:$0xff]  ;;  %v22_v46 = vld [vmem:[%s543_s0 + $0x40] sm:$0xff] }
  0x1b   :  { %v26_v43 = vpack.c.bf16 %v20_v39, %v18_v37  ;;  %v28_v47 = vpack.c.bf16 %v22_v46, %v22_v46  ;;  %v126_v51 = vld [vmem:[%s544_s2] sm:$0x3] }
  0x1d   :  { %272 = vmatpush1.bf16.msra.mxu1 %v106_v48  ;;  %151 = vmatpush1.bf16.msra.mxu0 %v106_v48  ;;  %v128_v48 = vlaneseq }
  0x1e   :  { %257 = vmatprep.subr.bf16.mxu1 %v109_v50  ;;  %152 = vmatprep.subr.bf16.mxu0 %v109_v50 }
  0x1f   :  { %v129_v49 = vshrl.u32 %v128_v48, 7 }
  0x21   :  { %273 = vmatpush1.bf16.msra.mxu1 %v108_v55  ;;  %153 = vmatpush1.bf16.msra.mxu0 %v108_v55  ;;  %v130_v50 = vsub.s32 0, %v129_v49  ;;  %v134_v52 = vsub.s32 1, %v129_v49 }
  0x22   :  { %258 = vmatprep.subr.bf16.mxu1 %v111_v56  ;;  %154 = vmatprep.subr.bf16.mxu0 %v111_v56 }
  0x23   :  { %v131_v53 = vrot.slane %v126_v51, %v130_v50  ;;  %v135_v54 = vrot.slane %v126_v51, %v134_v52 }
  0x25   :  { %274 = vmatpush1.bf16.msra.mxu1 %v110_v61  ;;  %155 = vmatpush1.bf16.msra.mxu0 %v110_v61 }
  0x26   :  { %259 = vmatprep.subr.bf16.mxu1 %v113_v62  ;;  %156 = vmatprep.subr.bf16.mxu0 %v113_v62 }
  0x29   :  { %275 = vmatpush1.bf16.msra.mxu1 %v112_v3  ;;  %157 = vmatpush1.bf16.msra.mxu0 %v112_v3 }
  0x2a   :  { %260 = vmatprep.subr.bf16.mxu1 %v115_v4  ;;  %158 = vmatprep.subr.bf16.mxu0 %v115_v4 }
  0x2d   :  { %276 = vmatpush1.bf16.msra.mxu1 %v114_v9  ;;  %159 = vmatpush1.bf16.msra.mxu0 %v114_v9 }
  0x2e   :  { %261 = vmatprep.subr.bf16.mxu1 %v117_v10  ;;  %160 = vmatprep.subr.bf16.mxu0 %v117_v10 }
  0x31   :  { %277 = vmatpush1.bf16.msra.mxu1 %v116_v15  ;;  %161 = vmatpush1.bf16.msra.mxu0 %v116_v15 }
  0x32   :  { %262 = vmatprep.subr.bf16.mxu1 %v119_v16  ;;  %162 = vmatprep.subr.bf16.mxu0 %v119_v16 }
  0x35   :  { %278 = vmatpush1.bf16.msra.mxu1 %v118_v21  ;;  %163 = vmatpush1.bf16.msra.mxu0 %v118_v21 }
  0x36   :  { %263 = vmatprep.subr.bf16.mxu1 %v121_v22  ;;  %164 = vmatprep.subr.bf16.mxu0 %v121_v22 }
  0x39   :  { %279 = vmatpush1.bf16.msra.mxu1 %v120_v27  ;;  %165 = vmatpush1.bf16.msra.mxu0 %v120_v27 }
  0x3a   :  { %264 = vmatprep.subr.bf16.mxu1 %v123_v28  ;;  %166 = vmatprep.subr.bf16.mxu0 %v123_v28 }
  0x3d   :  { %280 = vmatpush1.bf16.msra.mxu1 %v122_v33  ;;  %167 = vmatpush1.bf16.msra.mxu0 %v122_v33 }
  0x3e   :  { %265 = vmatprep.subr.bf16.mxu1 %v125_v34  ;;  %168 = vmatprep.subr.bf16.mxu0 %v125_v34 }
  0x41   :  { %281 = vmatpush1.bf16.msra.mxu1 %v124_v38  ;;  %169 = vmatpush1.bf16.msra.mxu0 %v124_v38 }
  0x44   :  { %181 = vmatmul.mubr.bf16.vlgmr.msra.gmra.mrb[0].mxu1 %v26_v43  ;;  %171 = vmatmul.mubr.bf16.vlgmr.msra.gmra.mrb[0].mxu0 %v24_v44 }
  0x45   :  { %190 = vmatprep.mubr.bf16.mxu1 %v29_v45 }
  0x4c   :  { %191 = vmatmul.mubr.bf16.gmra.mrb[4].mxu1 %v28_v47 }
 0x117   :  { %v182_v55 = vpop.f32.mrb[0].mxu1  ;;  %v172_v56 = vpop.f32.mrb[0].mxu0 }
 0x118   :  { %v183_v57 = vadd.f32 %v182_v55, %v131_v53  ;;  %v184_v58 = vpop.f32.mrb[1].mxu1  ;;  %v173_v59 = vadd.f32 %v172_v56, %v131_v53  ;;  %v174_v60 = vpop.f32.mrb[1].mxu0 }
 0x119   :  { %v185_v61 = vadd.f32 %v184_v58, %v135_v54  ;;  %v186_v62 = vpop.f32.mrb[2].mxu1  ;;  %v175_v63 = vadd.f32 %v174_v60, %v135_v54  ;;  %v176_v0 = vpop.f32.mrb[2].mxu0 }
 0x11a   :  { %v187_v1 = vadd.f32 %v186_v62, %v131_v53  ;;  %v188_v2 = vpop.f32.mrb[3].mxu1  ;;  %v177_v3 = vadd.f32 %v176_v0, %v131_v53  ;;  %v178_v4 = vpop.f32.mrb[3].mxu0 }
 0x11b   :  { %v247_v5 = vpack.c.bf16 %v185_v61, %v183_v57  ;;  %v189_v6 = vadd.f32 %v188_v2, %v135_v54  ;;  %v245_v7 = vpack.c.bf16 %v175_v63, %v173_v59  ;;  %v179_v8 = vadd.f32 %v178_v4, %v135_v54 }
 0x11d   :  { %233 = vst [vmem:[%s545_s3 + $0x10] sm:$0xff] %v247_v5  ;;  %v248_v9 = vpack.c.bf16 %v189_v6, %v187_v1  ;;  %231 = vst [vmem:[%s545_s3] sm:$0xff] %v245_v7  ;;  %v246_v10 = vpack.c.bf16 %v179_v8, %v177_v3 }
 0x11f   :  { %234 = vst [vmem:[%s545_s3 + $0x18] sm:$0xff] %v248_v9  ;;  %232 = vst [vmem:[%s545_s3 + $0x8] sm:$0xff] %v246_v10  ;;  %v192_v11 = vpop.f32.mrb[4].mxu1 }
 0x120   :  { %v193_v12 = vadd.f32 %v192_v11, %v131_v53  ;;  %v194_v13 = vpop.f32.mrb[5].mxu1 }
 0x121   :  { %v195_v14 = vadd.f32 %v194_v13, %v135_v54  ;;  %v196_v15 = vpop.f32.mrb[6].mxu1 }
 0x122   :  { %v197_v16 = vpop.f32.mrb[7].mxu1 }
 0x123   :  { %v249_v17 = vpack.c.bf16 %v195_v14, %v193_v12 }
 0x125   :  { %235 = vst [vmem:[%s545_s3 + $0x20] sm:$0xff] %v249_v17 }

// kernel: attention_forward.8
= control target key start
LH: loop header
LB: loop body
LE: loop exit
PB: predicated region body
PF: predicated region fallthrough
CT: control target
= control target key end

     0   :  { %s1380_s15 = smov 0   ;;  %s1382_s16 = smov 0   ;;  %s1559_s0 = inlined_call_operand.vmem [shape: bf16[2,24,256], index: 0, kind: input, shape index: {}]   ;;  %s1560_s1 = inlined_call_operand.vmem [shape: bf16[2,128,256], index: 1, kind: input, shape index: {}]   ;;  %s1561_s2 = inlined_call_operand.vmem [shape: bf16[2,128,256], index: 2, kind: input, shape index: {}]   ;;  %s1562_s3 = inlined_call_operand.vmem [shape: bf16[2,24,256], index: 3, kind: output, shape index: {0}]   ;;  %s1563_s4 = inlined_call_operand.vmem [shape: f32[2,2,24,128], index: 4, kind: output, shape index: {1}]  }
   0x1   :  { %s1384_s17 = smov 0   ;;  %s1386_s18 = smov 0  }
   0x2   :  { %s1388_s19 = smov 0   ;;  %s1390_s20 = smov 0  }
   0x3   :  { %s1392_s21 = smov 0  }
   0x4 LB: > { %s30_s22 = sadd.s32 1, %s1345_s19  ;;  %s34_s23 = sadd.s32 1, %s1349_s20  ;;  %s1353_s21 = sphi %s1392_s21, %s15_s21   ;;  %s1349_s20 = sphi %s1390_s20, %s1571_s20   ;;  %s1345_s19 = sphi %s1388_s19, %s1570_s19   ;;  %s1341_s18 = sphi %s1386_s18, %s1569_s18   ;;  %s1337_s17 = sphi %s1384_s17, %s1568_s17   ;;  %s1333_s16 = sphi %s1382_s16, %s1567_s16   ;;  %s1329_s15 = sphi %s1380_s15, %s1566_s15  }
   0x5   : > { %p32_p0 = scmp.ge.s32.totalorder %s30_s22, 2  ;;  %s1100_s24 = sadd.s32 4294967295, %s1353_s21  }
   0x6   : > { %p52_p1 = scmp.ne.s32.totalorder %s1333_s16, %s1329_s15  ;;  %p53_p2 = scmp.eq.s32.totalorder %s1353_s21, 0 }
   0x7   : > { %s1573_s22 = smov (%p32_p0, %s30_s22), 0  ;;  %s1575_s23 = smov (!%p32_p0, %s34_s23), %s1349_s20 }
   0x8   : > { %p36_p3 = scmp.ge.s32.totalorder %s1575_s23, 2  ;;  %p142_p4 = scmp.eq.s32.totalorder %s1100_s24, 3 }
   0x9   : > { %s41_s25 = ssub.s32 %s1345_s19, %s1573_s22  ;;  %p1426_p5 = por %p53_p2, %p52_p1 }
   0xa   : > { %s1577_s23 = smov (%p36_p3, %s1575_s23), 0  ;;  %p1432_p6 = por %p142_p4, %p52_p1 }
   0xb   : > { %s38_s28 = ssub.s32 %s1349_s20, %s1577_s23  ;;  %s45_s30 = sadd.s32 1, %s1333_s16 }
   0xc   : > { %s42_s29 = sor.u32 %s41_s25, %s38_s28  ;;  %p1103_p8 = scmp.ge.s32.totalorder %s1353_s21, 4 }
   0xd   : > { %p43_p7 = scmp.eq.s32.totalorder %s42_s29, 0 }
   0xe   : > { %194 = sbr.rel (%p1103_p8) target bundleno = 62 (0x3e), region = 16 }
   0xf   : > { %s1440_s5 = scalar_select %p43_p7, %s1333_s16, %s45_s30  }
  0x15   : > { %197 = sbr.rel (!%p1426_p5) target bundleno = 30 (0x1e), region = 20  ;;  %s199_s6 = sand.u32 (%p1426_p5), 1, %s1333_s16  }
  0x16   : > { %s1208_s7 = smul.u32 (%p1426_p5), 6, %s1349_s20 }
  0x17   : > { %s1207_s8 = smul.u32 (%p1426_p5), 12, %s199_s6 }
  0x18   : > { %s206_s9 = sadd.s32 (%p1426_p5), %s1345_s19, %s1208_s7 }
  0x19   : > { %s1104_s10 = sshll.u32 (%p1426_p5), %s206_s9, 2  ;;  %s201_s14 = scalar_lea.vmem (%p1426_p5), [#allocation2], %s1207_s8 }
  0x1a   : > { %s208_s13 = scalar_lea.vmem (%p1426_p5), %s1559_s0, %s1104_s10 }
  0x1b   : > { %v224_v0 = vld [vmem:[%s208_s13] sm:$0xf] (%p1426_p5)  ;;  %v226_v1 = vld [vmem:[%s208_s13 + $0x8] sm:$0xf] (%p1426_p5)  ;;  %v228_v2 = vld [vmem:[%s208_s13 + $0x10] sm:$0xf] (%p1426_p5) }
  0x1c   : > { %225 = vst [vmem:[%s201_s14] sm:$0xf] %v224_v0  ;;  %227 = vst [vmem:[%s201_s14 + $0x4] sm:$0xf] %v226_v1 }
  0x1d   : > { %229 = vst [vmem:[%s201_s14 + $0x8] sm:$0xf] %v228_v2 }
  0x1e PF: > { %258 = sbr.rel (!%p1426_p5) target bundleno = 46 (0x2e), region = 61  ;;  %s260_s24 = sand.u32 (%p1426_p5), 1, %s1333_s16  }
  0x1f   : > { %s1106_s25 = sshll.u32 (%p1426_p5), %s1349_s20, 5  ;;  %s1105_s28 = sshll.u32 (%p1426_p5), %s260_s24, 6 }
  0x20   : > { %s264_s29 = sadd.s32 (%p1426_p5), %s1345_s19, %s1106_s25  ;;  %s262_s8 = scalar_lea.vmem (%p1426_p5), [#allocation3], %s1105_s28 }
  0x21   : > { %s1107_s30 = sshll.u32 (%p1426_p5), %s264_s29, 2 }
  0x22   : > { %s1459_s9 = scalar_lea.vmem (%p1426_p5), %s1560_s1, %s1107_s30 }
  0x23   : > { %v282_v3 = vld [vmem:[%s1459_s9] sm:$0xf] (%p1426_p5)  ;;  %v284_v4 = vld [vmem:[%s1459_s9 + $0x8] sm:$0xf] (%p1426_p5)  ;;  %v286_v5 = vld [vmem:[%s1459_s9 + $0x10] sm:$0xf] (%p1426_p5) }
  0x24   : > { %283 = vst [vmem:[%s262_s8] sm:$0xf] (%p1426_p5), %v282_v3  ;;  %285 = vst [vmem:[%s262_s8 + $0x4] sm:$0xf] (%p1426_p5), %v284_v4  ;;  %v288_v6 = vld [vmem:[%s1459_s9 + $0x18] sm:$0xf] (%p1426_p5) }
  0x25   : > { %287 = vst [vmem:[%s262_s8 + $0x8] sm:$0xf] %v286_v5  ;;  %v290_v7 = vld [vmem:[%s1459_s9 + $0x20] sm:$0xf]  ;;  %v292_v8 = vld [vmem:[%s1459_s9 + $0x28] sm:$0xf] }
  0x26   : > { %289 = vst [vmem:[%s262_s8 + $0xc] sm:$0xf] %v288_v6  ;;  %291 = vst [vmem:[%s262_s8 + $0x10] sm:$0xf] %v290_v7  ;;  %v294_v9 = vld [vmem:[%s1459_s9 + $0x30] sm:$0xf] }
  0x27   : > { %293 = vst [vmem:[%s262_s8 + $0x14] sm:$0xf] %v292_v8  ;;  %v296_v10 = vld [vmem:[%s1459_s9 + $0x38] sm:$0xf]  ;;  %v298_v11 = vld [vmem:[%s1459_s9 + $0x40] sm:$0xf] }
  0x28   : > { %295 = vst [vmem:[%s262_s8 + $0x18] sm:$0xf] %v294_v9  ;;  %297 = vst [vmem:[%s262_s8 + $0x1c] sm:$0xf] %v296_v10  ;;  %v300_v12 = vld [vmem:[%s1459_s9 + $0x48] sm:$0xf] }
  0x29   : > { %299 = vst [vmem:[%s262_s8 + $0x20] sm:$0xf] %v298_v11  ;;  %v302_v13 = vld [vmem:[%s1459_s9 + $0x50] sm:$0xf]  ;;  %v304_v14 = vld [vmem:[%s1459_s9 + $0x58] sm:$0xf] }
  0x2a   : > { %301 = vst [vmem:[%s262_s8 + $0x24] sm:$0xf] %v300_v12  ;;  %303 = vst [vmem:[%s262_s8 + $0x28] sm:$0xf] %v302_v13  ;;  %v306_v15 = vld [vmem:[%s1459_s9 + $0x60] sm:$0xf] }
  0x2b   : > { %305 = vst [vmem:[%s262_s8 + $0x2c] sm:$0xf] %v304_v14  ;;  %v308_v16 = vld [vmem:[%s1459_s9 + $0x68] sm:$0xf]  ;;  %v310_v17 = vld [vmem:[%s1459_s9 + $0x70] sm:$0xf] }
  0x2c   : > { %307 = vst [vmem:[%s262_s8 + $0x30] sm:$0xf] %v306_v15  ;;  %309 = vst [vmem:[%s262_s8 + $0x34] sm:$0xf] %v308_v16  ;;  %v312_v18 = vld [vmem:[%s1459_s9 + $0x78] sm:$0xf] }
  0x2d   : > { %311 = vst [vmem:[%s262_s8 + $0x38] sm:$0xf] %v310_v17  ;;  %313 = vst [vmem:[%s262_s8 + $0x3c] sm:$0xf] %v312_v18 }
  0x2e PF: > { %368 = sbr.rel (!%p1426_p5) target bundleno = 62 (0x3e), region = 102  ;;  %s370_s10 = sand.u32 (%p1426_p5), 1, %s1333_s16  }
  0x2f   : > { %s1109_s11 = sshll.u32 (%p1426_p5), %s1349_s20, 5  ;;  %s1108_s12 = sshll.u32 (%p1426_p5), %s370_s10, 6 }
  0x30   : > { %s374_s13 = sadd.s32 (%p1426_p5), %s1345_s19, %s1109_s11  ;;  %s372_s26 = scalar_lea.vmem (%p1426_p5), [#allocation4], %s1108_s12 }
  0x31   : > { %s1110_s14 = sshll.u32 (%p1426_p5), %s374_s13, 2 }
  0x32   : > { %s1485_s28 = scalar_lea.vmem (%p1426_p5), %s1561_s2, %s1110_s14 }
  0x33   : > { %v392_v19 = vld [vmem:[%s1485_s28] sm:$0xf] (%p1426_p5)  ;;  %v394_v20 = vld [vmem:[%s1485_s28 + $0x8] sm:$0xf] (%p1426_p5)  ;;  %v396_v21 = vld [vmem:[%s1485_s28 + $0x10] sm:$0xf] (%p1426_p5) }
  0x34   : > { %393 = vst [vmem:[%s372_s26] sm:$0xf] (%p1426_p5), %v392_v19  ;;  %395 = vst [vmem:[%s372_s26 + $0x4] sm:$0xf] (%p1426_p5), %v394_v20  ;;  %v398_v22 = vld [vmem:[%s1485_s28 + $0x18] sm:$0xf] (%p1426_p5) }
  0x35   : > { %397 = vst [vmem:[%s372_s26 + $0x8] sm:$0xf] %v396_v21  ;;  %v400_v23 = vld [vmem:[%s1485_s28 + $0x20] sm:$0xf]  ;;  %v402_v24 = vld [vmem:[%s1485_s28 + $0x28] sm:$0xf] }
  0x36   : > { %399 = vst [vmem:[%s372_s26 + $0xc] sm:$0xf] %v398_v22  ;;  %401 = vst [vmem:[%s372_s26 + $0x10] sm:$0xf] %v400_v23  ;;  %v404_v25 = vld [vmem:[%s1485_s28 + $0x30] sm:$0xf] }
  0x37   : > { %403 = vst [vmem:[%s372_s26 + $0x14] sm:$0xf] %v402_v24  ;;  %v406_v26 = vld [vmem:[%s1485_s28 + $0x38] sm:$0xf]  ;;  %v408_v27 = vld [vmem:[%s1485_s28 + $0x40] sm:$0xf] }
  0x38   : > { %405 = vst [vmem:[%s372_s26 + $0x18] sm:$0xf] %v404_v25  ;;  %407 = vst [vmem:[%s372_s26 + $0x1c] sm:$0xf] %v406_v26  ;;  %v410_v28 = vld [vmem:[%s1485_s28 + $0x48] sm:$0xf] }
  0x39   : > { %409 = vst [vmem:[%s372_s26 + $0x20] sm:$0xf] %v408_v27  ;;  %v412_v29 = vld [vmem:[%s1485_s28 + $0x50] sm:$0xf]  ;;  %v414_v30 = vld [vmem:[%s1485_s28 + $0x58] sm:$0xf] }
  0x3a   : > { %411 = vst [vmem:[%s372_s26 + $0x24] sm:$0xf] %v410_v28  ;;  %413 = vst [vmem:[%s372_s26 + $0x28] sm:$0xf] %v412_v29  ;;  %v416_v31 = vld [vmem:[%s1485_s28 + $0x60] sm:$0xf] }
  0x3b   : > { %415 = vst [vmem:[%s372_s26 + $0x2c] sm:$0xf] %v414_v30  ;;  %v418_v32 = vld [vmem:[%s1485_s28 + $0x68] sm:$0xf]  ;;  %v420_v33 = vld [vmem:[%s1485_s28 + $0x70] sm:$0xf] }
  0x3c   : > { %417 = vst [vmem:[%s372_s26 + $0x30] sm:$0xf] %v416_v31  ;;  %419 = vst [vmem:[%s372_s26 + $0x34] sm:$0xf] %v418_v32  ;;  %v422_v34 = vld [vmem:[%s1485_s28 + $0x78] sm:$0xf] }
  0x3d   : > { %421 = vst [vmem:[%s372_s26 + $0x38] sm:$0xf] %v420_v33  ;;  %423 = vst [vmem:[%s372_s26 + $0x3c] sm:$0xf] %v422_v34 }
  0x3e PF: > { %p1111_p9 = scmp.ge.s32.totalorder %s1353_s21, 1  ;;  %p477_p10 = scmp.lt.s32.totalorder %s1353_s21, 5 }
  0x40   : > { %p478_p11 = pnand %p1111_p9, %p477_p10 }
  0x41   : > { %s484_s29 = sand.u32 (!%p478_p11), 1, %s1329_s15   ;;  %p546_p12 = scmp.lt.s32.totalorder (!%p478_p11), %s1341_s18, 1  ;;  %v707_v45 = vlaneseq (!%p478_p11) }
  0x42   : > { %481 = sbr.rel (%p478_p11) target bundleno = 895 (0x37f), region = 143  ;;  %s1506_s30 = sshll.u32 (!%p478_p11), %s484_s29, 6 }
  0x43   : > { %s493_s6 = scalar_lea.vmem (!%p478_p11), [#allocation3], %s1506_s30  ;;  %s1509_s7 = smul.u32 (!%p478_p11), 12, %s484_s29  ;;  %v708_v46 = vand.u32 (!%p478_p11), 127, %v707_v45 }
  0x44   : > { %v1269_v35 = vld [vmem:[%s493_s6] sm:$0xff] (!%p478_p11)   ;;  %v1270_v36 = vld [vmem:[%s493_s6 + $0x8] sm:$0xff] (!%p478_p11)   ;;  %v1271_v37 = vld [vmem:[%s493_s6 + $0x10] sm:$0xff] (!%p478_p11)   ;;  %p548_p13 = scmp.lt.s32.totalorder (!%p478_p11), %s1337_s17, 1  ;;  %s1520_s28 = scalar_lea.vmem (!%p478_p11), [#allocation4], %s1506_s30 }
  0x45   : > { %1167 = vmatprep.subr.bf16.mxu0 (!%p478_p11), %v1269_v35  ;;  %s486_s9 = scalar_lea.vmem (!%p478_p11), [#allocation2], %s1509_s7  ;;  %v1272_v39 = vld [vmem:[%s493_s6 + $0x18] sm:$0xff] (!%p478_p11)   ;;  %v1273_v40 = vld [vmem:[%s493_s6 + $0x20] sm:$0xff] (!%p478_p11)   ;;  %v1274_v41 = vld [vmem:[%s493_s6 + $0x28] sm:$0xff] (!%p478_p11)   ;;  %vm709_vm0 = vcmp.lt.s32.totalorder (!%p478_p11), %v708_v46, 40  ;;  %s527_s26 = scalar_lea.vmem (!%p478_p11), [#allocation5], %s1509_s7 }
  0x46   : > { %1168 = vmatpush3.bf16.xpose.msra.mxu0 (!%p478_p11), %v1269_v35  ;;  %v1277_v38 = vld [vmem:[%s486_s9] sm:$0xff] (!%p478_p11)   ;;  %v1278_v44 = vld [vmem:[%s486_s9 + $0x8] ss:$0 sps:$4 sm:$0xff] (!%p478_p11)   ;;  %v1279_v57 = vld [vmem:[%s1520_s28] sm:$0xff] (!%p478_p11)  }
  0x47   : > { %1169 = vmatprep.subr.bf16.mxu0 (!%p478_p11), %v1270_v36  ;;  %1183 = vmatprep.mubr.bf16.mxu0 (!%p478_p11), %v1277_v38  ;;  %v1275_v42 = vld [vmem:[%s493_s6 + $0x30] sm:$0xff] (!%p478_p11)   ;;  %v1276_v43 = vld [vmem:[%s493_s6 + $0x38] sm:$0xff] (!%p478_p11)   ;;  %v1280_v58 = vld [vmem:[%s1520_s28 + $0x8] sm:$0xff] (!%p478_p11)  }
  0x48   : > { %1187 = vmatprep.subr.bf16.mxu1 (!%p478_p11), %v1279_v57  ;;  %v1281_v59 = vld [vmem:[%s1520_s28 + $0x10] sm:$0xff] (!%p478_p11)   ;;  %v1282_v8 = vld [vmem:[%s1520_s28 + $0x18] sm:$0xff] (!%p478_p11)   ;;  %v1283_v9 = vld [vmem:[%s1520_s28 + $0x20] sm:$0xff] (!%p478_p11)  }
  0x49   : > { %s547_s15 = scalar_select %p546_p12, %s1341_s18, 1  ;;  %1188 = vmatpush3.bf16.msra.mxu1 %v1279_v57  ;;  %v1284_v10 = vld [vmem:[%s1520_s28 + $0x28] sm:$0xff]   ;;  %v1285_v11 = vld [vmem:[%s1520_s28 + $0x30] sm:$0xff]   ;;  %v1286_v12 = vld [vmem:[%s1520_s28 + $0x38] sm:$0xff]  }
  0x4a   : > { %s549_s8 = scalar_select %p548_p13, %s1337_s17, 1  ;;  %1189 = vmatprep.subr.bf16.mxu1 %v1280_v58 }
  0x4b   : > { %s1211_s10 = smul.u32 6, %s547_s15 }
  0x4c   : > { %s1210_s11 = smul.u32 3, %s549_s8 }
  0x4d   : > { %1190 = vmatpush3.bf16.msra.mxu1 %v1280_v58  ;;  %s1212_s29 = smul.u32 (%p1432_p6), 6, %s1341_s18 }
  0x4e   : > { %1170 = vmatpush3.bf16.xpose.msra.mxu0 %v1270_v36  ;;  %s555_s12 = sadd.s32 %s1211_s10, %s1210_s11  ;;  %1191 = vmatprep.subr.bf16.mxu1 %v1281_v59 }
  0x4f   : > { %1171 = vmatprep.subr.bf16.mxu0 %v1271_v37  ;;  %s1114_s13 = sshll.u32 %s555_s12, 3  ;;  %s878_s30 = sadd.s32 (%p1432_p6), %s1337_s17, %s1212_s29 }
  0x50   : > { %s557_s25 = scalar_lea.vmem %s1563_s4, %s1114_s13  ;;  %s1136_s6 = sshll.u32 (%p1432_p6), %s878_s30, 2 }
  0x51   : > { %1192 = vmatpush3.bf16.msra.mxu1 %v1281_v59  ;;  %s880_s8 = scalar_lea.vmem (%p1432_p6), %s1562_s3, %s1136_s6 }
  0x52   : > { %1193 = vmatprep.subr.bf16.mxu1 %v1282_v8 }
  0x55   : > { %1194 = vmatpush3.bf16.msra.mxu1 %v1282_v8 }
  0x56   : > { %1172 = vmatpush3.bf16.xpose.msra.mxu0 %v1271_v37  ;;  %1195 = vmatprep.subr.bf16.mxu1 %v1283_v9 }
  0x57   : > { %1173 = vmatprep.subr.bf16.mxu0 %v1272_v39 }
  0x59   : > { %1196 = vmatpush3.bf16.msra.mxu1 %v1283_v9 }
  0x5a   : > { %1197 = vmatprep.subr.bf16.mxu1 %v1284_v10 }
  0x5d   : > { %1198 = vmatpush3.bf16.msra.mxu1 %v1284_v10 }
  0x5e   : > { %1174 = vmatpush3.bf16.xpose.msra.mxu0 %v1272_v39  ;;  %1199 = vmatprep.subr.bf16.mxu1 %v1285_v11 }
  0x5f   : > { %1175 = vmatprep.subr.bf16.mxu0 %v1273_v40 }
  0x61   : > { %1200 = vmatpush3.bf16.msra.mxu1 %v1285_v11 }
  0x62   : > { %1201 = vmatprep.subr.bf16.mxu1 %v1286_v12 }
  0x65   : > { %1202 = vmatpush3.bf16.msra.mxu1 %v1286_v12 }
  0x66   : > { %1176 = vmatpush3.bf16.xpose.msra.mxu0 %v1273_v40 }
  0x67   : > { %1177 = vmatprep.subr.bf16.mxu0 %v1274_v41 }
  0x6e   : > { %1178 = vmatpush3.bf16.xpose.msra.mxu0 %v1274_v41 }
  0x6f   : > { %1179 = vmatprep.subr.bf16.mxu0 %v1275_v42 }
  0x76   : > { %1180 = vmatpush3.bf16.xpose.msra.mxu0 %v1275_v42 }
  0x77   : > { %1181 = vmatprep.subr.bf16.mxu0 %v1276_v43 }
  0x7e   : > { %1182 = vmatpush3.bf16.xpose.msra.mxu0 %v1276_v43 }
  0x85   : > { %1184 = vmatmul.mubr.bf16.vlgmr.msra.gmra.mrb[0].mxu0 %v1278_v44 }
 0x158   : > { %v1185_v47 = vpop.f32.mrb[0].mxu0 }
 0x159   : > { %v703_v48 = vmul.f32 0.088388346, %v1185_v47  ;;  %v687_v49 = vpop.f32.mrb[1].mxu0 }
 0x15a   : > { %v701_v50 = vmul.f32 0.088388346, %v687_v49  ;;  %v1186_v51 = vpop.f32.mrb[2].mxu0 }
 0x15b   : > { %706 = vst [vmem:[%s557_s25 + $0x10] sm:$0xff] %v703_v48  ;;  %v690_v52 = vpop.f32.mrb[3].mxu0  ;;  %v712_v53 = vsel %vm709_vm0, %v703_v48, -1e+30 }
 0x15c   : > { %704 = vst [vmem:[%s557_s25] sm:$0xff] %v701_v50  ;;  %v702_v54 = vmul.f32 0.088388346, %v690_v52  ;;  %717 = vmax.xlane.f32.xlu1 %v712_v53  ;;  %v710_v55 = vsel %vm709_vm0, %v701_v50, -1e+30 }
 0x15d   : > { %713 = vmax.xlane.f32.xlu0 %v710_v55 }
 0x15e   : > { %705 = vst [vmem:[%s557_s25 + $0x8] sm:$0xff] %v702_v54  ;;  %v711_v56 = vsel %vm709_vm0, %v702_v54, -1e+30 }
 0x161   : > { %715 = vmax.xlane.f32.xlu0 %v711_v56 }
 0x1e9   : > { %v718_v60 = vpop.xlane.xlu1 %717 }
 0x1ea   : > { %v721_v61 = vsub.f32 %v712_v53, %v718_v60  ;;  %v714_v62 = vpop.xlane.xlu0 %713 }
 0x1eb   : > { %v719_v63 = vsub.f32 %v710_v55, %v714_v62 }
 0x1ec   : > { %v726_v1 = vmul.f32 1.442695, %v721_v61 }
 0x1ed   : > { %v722_v0 = vmul.f32 1.442695, %v719_v63 }
 0x1ee   : > { %v716_v2 = vpop.xlane.xlu0 %715 }
 0x1ef   : > { %1287 = vpow2.f32 %v722_v0  ;;  %v720_v3 = vsub.f32 %v711_v56, %v716_v2 }
 0x1f0   : > { %1289 = vpow2.f32 %v726_v1 }
 0x1f1   : > { %v724_v4 = vmul.f32 1.442695, %v720_v3 }
 0x1f3   : > { %1291 = vpow2.f32 %v724_v4 }
 0x1f9   : > { %v1288_v5 = vpop.eup %1287 }
 0x1fa   : > { %728 = vadd.xlane.f32.xlu1 %v1288_v5  ;;  %v1290_v6 = vpop.eup %1289 }
 0x1fd   : > { %v1292_v7 = vpop.eup %1291 }
 0x1fe   : > { %732 = vadd.xlane.f32.xlu1 %v1290_v6  ;;  %730 = vadd.xlane.f32.xlu0 %v1292_v7 }
 0x287   : > { %v729_v13 = vpop.xlane.xlu1 %728 }
 0x288   : > { %1293 = vrcp.f32 %v729_v13 }
 0x28b   : > { %v733_v14 = vpop.xlane.xlu1 %732  ;;  %v731_v15 = vpop.xlane.xlu0 %730 }
 0x28c   : > { %1295 = vrcp.f32 %v733_v14 }
 0x28d   : > { %1297 = vrcp.f32 %v731_v15 }
 0x292   : > { %v1294_v16 = vpop.eup %1293 }
 0x293   : > { %v737_v20 = vmul.f32 %v1294_v16, %v1288_v5 }
 0x296   : > { %v1296_v17 = vpop.eup %1295 }
 0x297   : > { %v1298_v18 = vpop.eup %1297  ;;  %v739_v19 = vmul.f32 %v1296_v17, %v1290_v6 }
 0x298   : > { %v738_v21 = vmul.f32 %v1298_v18, %v1292_v7 }
 0x299   : > { %v741_v22 = vpack.c.bf16 %v739_v19, %v739_v19 }
 0x29a   : > { %v740_v23 = vpack.c.bf16 %v738_v21, %v737_v20 }
 0x29c   : > { %1203 = vmatprep.mubr.bf16.mxu1 %v740_v23 }
 0x29d   : > { %1204 = vmatmul.mubr.bf16.vlgmr.msra.gmra.mrb[0].mxu1 %v741_v22 }
 0x370   : > { %v1205_v24 = vpop.f32.mrb[0].mxu1  ;;  %873 = sbr.rel (!%p1432_p6) target bundleno = 895 (0x37f), region = 159 }
 0x371   : > { %v1141_v25 = vpack.c.bf16 %v1205_v24, %v1205_v24  ;;  %v824_v26 = vpop.f32.mrb[1].mxu1 }
 0x372   : > { %v1206_v27 = vpop.f32.mrb[2].mxu1 }
 0x373   : > { %853 = vst [vmem:[%s527_s26 + $0x8] sm:$0xf] %v1141_v25  ;;  %v827_v28 = vpop.f32.mrb[3].mxu1 }
 0x374   : > { %v1145_v29 = vpack.c.bf16 %v827_v28, %v824_v26 }
 0x376   : > { %1146 = vst [vmem:[%s527_s26] sm:$0xff] %v1145_v29  }
 0x37a   : > { %v900_v32 = vld [vmem:[%s527_s26 + $0x8] sm:$0xf] }
 0x37b   : > { %901 = vst [vmem:[%s880_s8 + $0x10] sm:$0xf] %v900_v32 }
 0x37d   : > { %v896_v30 = vld [vmem:[%s527_s26] sm:$0xf]  ;;  %v898_v31 = vld [vmem:[%s527_s26 + $0x4] sm:$0xf] }
 0x37e   : > { %897 = vst [vmem:[%s880_s8] sm:$0xf] %v896_v30  ;;  %899 = vst [vmem:[%s880_s8 + $0x8] sm:$0xf] %v898_v31 }
 0x37f PF: > { %s15_s21 = sadd.s32 1, %s1353_s21   ;;  %s1566_s15 = smov %s1333_s16 }
 0x380   : > { %p12_p0 = scmp.ge.s32.totalorder %s15_s21, 6   ;;  %s1567_s16 = smov %s1440_s5 }
 0x381   : > { %s1568_s17 = smov %s1345_s19  ;;  %s1569_s18 = smov %s1349_s20 }
 0x382   : > { %s1570_s19 = smov %s1573_s22  ;;  %s1571_s20 = smov %s1577_s23 }
 0x383   :  { %14 = sbr.rel (!%p12_p0) target bundleno = 4 (0x4), region = 259 }

// kernel: attention_forward.9
= control target key start
LH: loop header
LB: loop body
LE: loop exit
PB: predicated region body
PF: predicated region fallthrough
CT: control target
= control target key end

     0   :  { %s535_s1 = inlined_call_operand.vmem [shape: f32[256,256], index: 1, kind: input, shape index: {}]   ;;  %s536_s0 = inlined_call_operand.vmem [shape: bf16[40,256], index: 0, kind: input, shape index: {}]   ;;  %s537_s2 = inlined_call_operand.vmem [shape: f32[1,256], index: 2, kind: input, shape index: {}]   ;;  %s538_s3 = inlined_call_operand.vmem [shape: f32[40,256], index: 3, kind: output, shape index: {}]  }
   0x1   :  { %v20_v0 = vld [vmem:[%s535_s1 + $0x8] sm:$0xff]  ;;  %v22_v1 = vld [vmem:[%s535_s1 + $0x18] sm:$0xff]  ;;  %v19_v2 = vld [vmem:[%s535_s1] sm:$0xff] }
   0x2   :  { %v84_v3 = vpack.c.bf16 %v22_v1, %v20_v0  ;;  %v21_v4 = vld [vmem:[%s535_s1 + $0x10] sm:$0xff]  ;;  %v24_v5 = vld [vmem:[%s535_s1 + $0x28] sm:$0xff]  ;;  %v26_v6 = vld [vmem:[%s535_s1 + $0x38] sm:$0xff] }
   0x3   :  { %v83_v7 = vpack.c.bf16 %v21_v4, %v19_v2  ;;  %v86_v8 = vpack.c.bf16 %v26_v6, %v24_v5  ;;  %v23_v9 = vld [vmem:[%s535_s1 + $0x20] sm:$0xff]  ;;  %v25_v10 = vld [vmem:[%s535_s1 + $0x30] sm:$0xff]  ;;  %v28_v11 = vld [vmem:[%s535_s1 + $0x48] sm:$0xff] }
   0x4   :  { %235 = vmatprep.subr.bf16.mxu1 %v84_v3  ;;  %154 = vmatprep.subr.bf16.mxu0 %v84_v3  ;;  %v30_v12 = vld [vmem:[%s535_s1 + $0x58] sm:$0xff]  ;;  %v85_v13 = vpack.c.bf16 %v25_v10, %v23_v9  ;;  %v27_v15 = vld [vmem:[%s535_s1 + $0x40] sm:$0xff]  ;;  %v29_v16 = vld [vmem:[%s535_s1 + $0x50] sm:$0xff] }
   0x5   :  { %251 = vmatpush1.bf16.msra.mxu1 %v83_v7  ;;  %155 = vmatpush1.bf16.msra.mxu0 %v83_v7  ;;  %v88_v14 = vpack.c.bf16 %v30_v12, %v28_v11  ;;  %v32_v17 = vld [vmem:[%s535_s1 + $0x68] sm:$0xff]  ;;  %v34_v18 = vld [vmem:[%s535_s1 + $0x78] sm:$0xff]  ;;  %v87_v19 = vpack.c.bf16 %v29_v16, %v27_v15  ;;  %v31_v21 = vld [vmem:[%s535_s1 + $0x60] sm:$0xff] }
   0x6   :  { %236 = vmatprep.subr.bf16.mxu1 %v86_v8  ;;  %156 = vmatprep.subr.bf16.mxu0 %v86_v8  ;;  %v90_v20 = vpack.c.bf16 %v34_v18, %v32_v17  ;;  %v33_v22 = vld [vmem:[%s535_s1 + $0x70] sm:$0xff]  ;;  %v36_v23 = vld [vmem:[%s535_s1 + $0x88] sm:$0xff]  ;;  %v38_v24 = vld [vmem:[%s535_s1 + $0x98] sm:$0xff] }
   0x7   :  { %v89_v25 = vpack.c.bf16 %v33_v22, %v31_v21  ;;  %v92_v26 = vpack.c.bf16 %v38_v24, %v36_v23  ;;  %v35_v27 = vld [vmem:[%s535_s1 + $0x80] sm:$0xff]  ;;  %v37_v28 = vld [vmem:[%s535_s1 + $0x90] sm:$0xff]  ;;  %v40_v29 = vld [vmem:[%s535_s1 + $0xa8] sm:$0xff] }
   0x8   :  { %v42_v30 = vld [vmem:[%s535_s1 + $0xb8] sm:$0xff]  ;;  %v91_v31 = vpack.c.bf16 %v37_v28, %v35_v27  ;;  %v39_v33 = vld [vmem:[%s535_s1 + $0xa0] sm:$0xff]  ;;  %v41_v34 = vld [vmem:[%s535_s1 + $0xb0] sm:$0xff] }
   0x9   :  { %252 = vmatpush1.bf16.msra.mxu1 %v85_v13  ;;  %157 = vmatpush1.bf16.msra.mxu0 %v85_v13  ;;  %v94_v32 = vpack.c.bf16 %v42_v30, %v40_v29  ;;  %v44_v35 = vld [vmem:[%s535_s1 + $0xc8] sm:$0xff]  ;;  %v46_v36 = vld [vmem:[%s535_s1 + $0xd8] sm:$0xff]  ;;  %v93_v37 = vpack.c.bf16 %v41_v34, %v39_v33  ;;  %v43_v38 = vld [vmem:[%s535_s1 + $0xc0] sm:$0xff] }
   0xa   :  { %237 = vmatprep.subr.bf16.mxu1 %v88_v14  ;;  %158 = vmatprep.subr.bf16.mxu0 %v88_v14  ;;  %v45_v39 = vld [vmem:[%s535_s1 + $0xd0] sm:$0xff]  ;;  %v96_v40 = vpack.c.bf16 %v46_v36, %v44_v35  ;;  %v48_v41 = vld [vmem:[%s535_s1 + $0xe8] sm:$0xff]  ;;  %v50_v42 = vld [vmem:[%s535_s1 + $0xf8] sm:$0xff] }
   0xb   :  { %v269_v43 = vld [vmem:[%s536_s0 + $0x14] ss:$8 sps:$4 sm:$0xff]   ;;  %v272_v44 = vld [vmem:[%s536_s0 + $0x4] ss:$8 sps:$4 sm:$0xff]   ;;  %v95_v45 = vpack.c.bf16 %v45_v39, %v43_v38  ;;  %v98_v46 = vpack.c.bf16 %v50_v42, %v48_v41  ;;  %v267_v35 = vld [vmem:[%s536_s0 + $0x10] ss:$8 sps:$4 sm:$0xff]   ;;  %v117_v39 = vlaneseq }
   0xc   :  { %v47_v47 = vld [vmem:[%s535_s1 + $0xe0] sm:$0xff]  ;;  %v49_v48 = vld [vmem:[%s535_s1 + $0xf0] sm:$0xff]  ;;  %v52_v49 = vld [vmem:[%s535_s1 + $0x108] sm:$0xff]  ;;  %196 = vmatprep.mubr.bf16.mxu1 %v269_v43  ;;  %186 = vmatprep.mubr.bf16.mxu0 %v272_v44 }
   0xd   :  { %253 = vmatpush1.bf16.msra.mxu1 %v87_v19  ;;  %159 = vmatpush1.bf16.msra.mxu0 %v87_v19  ;;  %v54_v50 = vld [vmem:[%s535_s1 + $0x118] sm:$0xff]  ;;  %v97_v51 = vpack.c.bf16 %v49_v48, %v47_v47  ;;  %v51_v53 = vld [vmem:[%s535_s1 + $0x100] sm:$0xff]  ;;  %v53_v54 = vld [vmem:[%s535_s1 + $0x110] sm:$0xff] }
   0xe   :  { %238 = vmatprep.subr.bf16.mxu1 %v90_v20  ;;  %160 = vmatprep.subr.bf16.mxu0 %v90_v20  ;;  %v100_v52 = vpack.c.bf16 %v54_v50, %v52_v49  ;;  %v56_v55 = vld [vmem:[%s535_s1 + $0x128] sm:$0xff]  ;;  %v58_v56 = vld [vmem:[%s535_s1 + $0x138] sm:$0xff]  ;;  %v99_v57 = vpack.c.bf16 %v53_v54, %v51_v53  ;;  %v55_v59 = vld [vmem:[%s535_s1 + $0x120] sm:$0xff] }
   0xf   :  { %v102_v58 = vpack.c.bf16 %v58_v56, %v56_v55  ;;  %v57_v60 = vld [vmem:[%s535_s1 + $0x130] sm:$0xff]  ;;  %v60_v61 = vld [vmem:[%s535_s1 + $0x148] sm:$0xff]  ;;  %v62_v62 = vld [vmem:[%s535_s1 + $0x158] sm:$0xff] }
  0x10   :  { %v101_v63 = vpack.c.bf16 %v57_v60, %v55_v59  ;;  %v104_v0 = vpack.c.bf16 %v62_v62, %v60_v61  ;;  %v59_v1 = vld [vmem:[%s535_s1 + $0x140] sm:$0xff]  ;;  %v61_v2 = vld [vmem:[%s535_s1 + $0x150] sm:$0xff]  ;;  %v64_v3 = vld [vmem:[%s535_s1 + $0x168] sm:$0xff] }
  0x11   :  { %254 = vmatpush1.bf16.msra.mxu1 %v89_v25  ;;  %161 = vmatpush1.bf16.msra.mxu0 %v89_v25  ;;  %v66_v4 = vld [vmem:[%s535_s1 + $0x178] sm:$0xff]  ;;  %v103_v5 = vpack.c.bf16 %v61_v2, %v59_v1  ;;  %v63_v7 = vld [vmem:[%s535_s1 + $0x160] sm:$0xff]  ;;  %v65_v8 = vld [vmem:[%s535_s1 + $0x170] sm:$0xff] }
  0x12   :  { %239 = vmatprep.subr.bf16.mxu1 %v92_v26  ;;  %162 = vmatprep.subr.bf16.mxu0 %v92_v26  ;;  %v106_v6 = vpack.c.bf16 %v66_v4, %v64_v3  ;;  %v68_v9 = vld [vmem:[%s535_s1 + $0x188] sm:$0xff]  ;;  %v70_v10 = vld [vmem:[%s535_s1 + $0x198] sm:$0xff]  ;;  %v105_v11 = vpack.c.bf16 %v65_v8, %v63_v7  ;;  %v67_v13 = vld [vmem:[%s535_s1 + $0x180] sm:$0xff] }
  0x13   :  { %v108_v12 = vpack.c.bf16 %v70_v10, %v68_v9  ;;  %v69_v14 = vld [vmem:[%s535_s1 + $0x190] sm:$0xff]  ;;  %v72_v15 = vld [vmem:[%s535_s1 + $0x1a8] sm:$0xff]  ;;  %v74_v16 = vld [vmem:[%s535_s1 + $0x1b8] sm:$0xff] }
  0x14   :  { %v107_v17 = vpack.c.bf16 %v69_v14, %v67_v13  ;;  %v110_v18 = vpack.c.bf16 %v74_v16, %v72_v15  ;;  %v71_v19 = vld [vmem:[%s535_s1 + $0x1a0] sm:$0xff]  ;;  %v73_v20 = vld [vmem:[%s535_s1 + $0x1b0] sm:$0xff]  ;;  %v76_v21 = vld [vmem:[%s535_s1 + $0x1c8] sm:$0xff] }
  0x15   :  { %255 = vmatpush1.bf16.msra.mxu1 %v91_v31  ;;  %163 = vmatpush1.bf16.msra.mxu0 %v91_v31  ;;  %v78_v22 = vld [vmem:[%s535_s1 + $0x1d8] sm:$0xff]  ;;  %v109_v23 = vpack.c.bf16 %v73_v20, %v71_v19  ;;  %v75_v25 = vld [vmem:[%s535_s1 + $0x1c0] sm:$0xff]  ;;  %v77_v26 = vld [vmem:[%s535_s1 + $0x1d0] sm:$0xff] }
  0x16   :  { %240 = vmatprep.subr.bf16.mxu1 %v94_v32  ;;  %164 = vmatprep.subr.bf16.mxu0 %v94_v32  ;;  %v112_v24 = vpack.c.bf16 %v78_v22, %v76_v21  ;;  %v80_v27 = vld [vmem:[%s535_s1 + $0x1e8] sm:$0xff]  ;;  %v82_v28 = vld [vmem:[%s535_s1 + $0x1f8] sm:$0xff]  ;;  %v111_v29 = vpack.c.bf16 %v77_v26, %v75_v25  ;;  %v79_v31 = vld [vmem:[%s535_s1 + $0x1e0] sm:$0xff] }
  0x17   :  { %v114_v30 = vpack.c.bf16 %v82_v28, %v80_v27  ;;  %v81_v32 = vld [vmem:[%s535_s1 + $0x1f0] sm:$0xff]  ;;  %v18_v34 = vld [vmem:[%s536_s0 + $0x20] sm:$0xff] }
  0x18   :  { %v113_v33 = vpack.c.bf16 %v81_v32, %v79_v31  ;;  %v270_v36 = vld [vmem:[%s536_s0] ss:$8 sps:$4 sm:$0xff]   ;;  %v233_v38 = vcombine.low %v18_v34, %v18_v34 }
  0x19   :  { %256 = vmatpush1.bf16.msra.mxu1 %v93_v37  ;;  %165 = vmatpush1.bf16.msra.mxu0 %v93_v37  ;;  %v234_v37 = vcombine.high %v18_v34, %v18_v34  ;;  %v115_v42 = vld [vmem:[%s537_s2] sm:$0x3] }
  0x1a   :  { %241 = vmatprep.subr.bf16.mxu1 %v96_v40  ;;  %166 = vmatprep.subr.bf16.mxu0 %v96_v40  ;;  %v118_v40 = vshrl.u32 %v117_v39, 7 }
  0x1c   :  { %v119_v41 = vsub.s32 0, %v118_v40  ;;  %v123_v43 = vsub.s32 1, %v118_v40 }
  0x1d   :  { %257 = vmatpush1.bf16.msra.mxu1 %v95_v45  ;;  %167 = vmatpush1.bf16.msra.mxu0 %v95_v45 }
  0x1e   :  { %242 = vmatprep.subr.bf16.mxu1 %v98_v46  ;;  %168 = vmatprep.subr.bf16.mxu0 %v98_v46  ;;  %v120_v44 = vrot.slane %v115_v42, %v119_v41  ;;  %v124_v45 = vrot.slane %v115_v42, %v123_v43 }
  0x21   :  { %258 = vmatpush1.bf16.msra.mxu1 %v97_v51  ;;  %169 = vmatpush1.bf16.msra.mxu0 %v97_v51 }
  0x22   :  { %243 = vmatprep.subr.bf16.mxu1 %v100_v52  ;;  %170 = vmatprep.subr.bf16.mxu0 %v100_v52 }
  0x25   :  { %259 = vmatpush1.bf16.msra.mxu1 %v99_v57  ;;  %171 = vmatpush1.bf16.msra.mxu0 %v99_v57 }
  0x26   :  { %244 = vmatprep.subr.bf16.mxu1 %v102_v58  ;;  %172 = vmatprep.subr.bf16.mxu0 %v102_v58 }
  0x29   :  { %260 = vmatpush1.bf16.msra.mxu1 %v101_v63  ;;  %173 = vmatpush1.bf16.msra.mxu0 %v101_v63 }
  0x2a   :  { %245 = vmatprep.subr.bf16.mxu1 %v104_v0  ;;  %174 = vmatprep.subr.bf16.mxu0 %v104_v0 }
  0x2d   :  { %261 = vmatpush1.bf16.msra.mxu1 %v103_v5  ;;  %175 = vmatpush1.bf16.msra.mxu0 %v103_v5 }
  0x2e   :  { %246 = vmatprep.subr.bf16.mxu1 %v106_v6  ;;  %176 = vmatprep.subr.bf16.mxu0 %v106_v6 }
  0x31   :  { %262 = vmatpush1.bf16.msra.mxu1 %v105_v11  ;;  %177 = vmatpush1.bf16.msra.mxu0 %v105_v11 }
  0x32   :  { %247 = vmatprep.subr.bf16.mxu1 %v108_v12  ;;  %178 = vmatprep.subr.bf16.mxu0 %v108_v12 }
  0x35   :  { %263 = vmatpush1.bf16.msra.mxu1 %v107_v17  ;;  %179 = vmatpush1.bf16.msra.mxu0 %v107_v17 }
  0x36   :  { %248 = vmatprep.subr.bf16.mxu1 %v110_v18  ;;  %180 = vmatprep.subr.bf16.mxu0 %v110_v18 }
  0x39   :  { %264 = vmatpush1.bf16.msra.mxu1 %v109_v23  ;;  %181 = vmatpush1.bf16.msra.mxu0 %v109_v23 }
  0x3a   :  { %249 = vmatprep.subr.bf16.mxu1 %v112_v24  ;;  %182 = vmatprep.subr.bf16.mxu0 %v112_v24 }
  0x3d   :  { %265 = vmatpush1.bf16.msra.mxu1 %v111_v29  ;;  %183 = vmatpush1.bf16.msra.mxu0 %v111_v29 }
  0x3e   :  { %250 = vmatprep.subr.bf16.mxu1 %v114_v30  ;;  %184 = vmatprep.subr.bf16.mxu0 %v114_v30 }
  0x41   :  { %266 = vmatpush1.bf16.msra.mxu1 %v113_v33  ;;  %185 = vmatpush1.bf16.msra.mxu0 %v113_v33 }
  0x44   :  { %197 = vmatmul.mubr.bf16.vlgmr.msra.gmra.mrb[0].mxu1 %v267_v35  ;;  %187 = vmatmul.mubr.bf16.vlgmr.msra.gmra.mrb[0].mxu0 %v270_v36 }
  0x45   :  { %206 = vmatprep.mubr.bf16.mxu1 %v234_v37 }
  0x4c   :  { %207 = vmatmul.mubr.bf16.gmra.mrb[4].mxu1 %v233_v38 }
 0x117   :  { %v198_v46 = vpop.f32.mrb[0].mxu1  ;;  %v188_v47 = vpop.f32.mrb[0].mxu0 }
 0x118   :  { %v199_v48 = vadd.f32 %v198_v46, %v120_v44  ;;  %v200_v49 = vpop.f32.mrb[1].mxu1  ;;  %v189_v50 = vadd.f32 %v188_v47, %v120_v44  ;;  %v190_v51 = vpop.f32.mrb[1].mxu0 }
 0x119   :  { %v201_v52 = vadd.f32 %v200_v49, %v124_v45  ;;  %v202_v53 = vpop.f32.mrb[2].mxu1  ;;  %v191_v54 = vadd.f32 %v190_v51, %v124_v45  ;;  %v192_v55 = vpop.f32.mrb[2].mxu0 }
 0x11a   :  { %219 = vst [vmem:[%s538_s3 + $0x20] sm:$0xff] %v199_v48  ;;  %v203_v56 = vadd.f32 %v202_v53, %v120_v44  ;;  %215 = vst [vmem:[%s538_s3] sm:$0xff] %v189_v50  ;;  %v204_v57 = vpop.f32.mrb[3].mxu1  ;;  %v193_v58 = vadd.f32 %v192_v55, %v120_v44  ;;  %v194_v59 = vpop.f32.mrb[3].mxu0 }
 0x11b   :  { %220 = vst [vmem:[%s538_s3 + $0x28] sm:$0xff] %v201_v52  ;;  %v205_v60 = vadd.f32 %v204_v57, %v124_v45  ;;  %216 = vst [vmem:[%s538_s3 + $0x8] sm:$0xff] %v191_v54  ;;  %v195_v61 = vadd.f32 %v194_v59, %v124_v45 }
 0x11c   :  { %221 = vst [vmem:[%s538_s3 + $0x30] sm:$0xff] %v203_v56  ;;  %217 = vst [vmem:[%s538_s3 + $0x10] sm:$0xff] %v193_v58 }
 0x11d   :  { %222 = vst [vmem:[%s538_s3 + $0x38] sm:$0xff] %v205_v60  ;;  %218 = vst [vmem:[%s538_s3 + $0x18] sm:$0xff] %v195_v61 }
 0x11f   :  { %v208_v62 = vpop.f32.mrb[4].mxu1 }
 0x120   :  { %v209_v63 = vadd.f32 %v208_v62, %v120_v44  ;;  %v210_v0 = vpop.f32.mrb[5].mxu1 }
 0x121   :  { %v211_v1 = vadd.f32 %v210_v0, %v124_v45  ;;  %v212_v2 = vpop.f32.mrb[6].mxu1 }
 0x122   :  { %223 = vst [vmem:[%s538_s3 + $0x40] sm:$0xff] %v209_v63  ;;  %v213_v3 = vpop.f32.mrb[7].mxu1 }
 0x123   :  { %224 = vst [vmem:[%s538_s3 + $0x48] sm:$0xff] %v211_v1 }

</bundles_post_ra>
